<compile_context>
chip_gen: v6e
topology: v6e:2x2x1
jax: 0.10.0
libtpu: 0.0.40
codegen_flags: <defaults>
</compile_context>

<pallas_src>
import math
import functools
from functools import lru_cache

import jax
import jax.numpy as jnp
from jax.experimental import pallas as pl
from jax.experimental.pallas import tpu as pltpu


# ----------------------------- in-kernel math ------------------------------

_GELU_C = math.sqrt(2.0 / math.pi)


def _gelu(x):
    # tanh-approximation GELU (EUP tanh instead of the exact-erf polynomial).
    return 0.5 * x * (1.0 + jnp.tanh(_GELU_C * (x + 0.044715 * x * x * x)))


def _layer_norm(x, gamma, beta, eps=1e-6, use_pl_recip=False):
    # UER-py LayerNorm: gamma * (x - mean) / (std + eps) + beta with the
    # *unbiased* torch.std (divide by n-1) and eps added to std.
    x = x.astype(jnp.float32)
    mean = jnp.mean(x, axis=-1, keepdims=True)
    xc = x - mean
    var = jnp.sum(xc * xc, axis=-1, keepdims=True) / (x.shape[-1] - 1)
    denom = jnp.sqrt(var) + eps
    inv = pl.reciprocal(denom, approx=True) if use_pl_recip else 1.0 / denom
    return gamma * xc * inv + beta


def _attention(x, add_mask, wqkv, bqkv, wo, bo, heads, q_rows=None):
    """UER MultiHeadedAttention (eval) with a fused lane-dense QKV projection.

    x        : (S, D) bf16 activations.
    add_mask : (1, S) f32 additive key mask (0 / -10000).
    wqkv     : (D, 3D) bf16, columns = [Q | K | V], 1/sqrt(dh) folded into Q.
    bqkv     : (1, 3D) f32 (Q part pre-scaled).
    wo       : (D, D) bf16 (unsplit output projection); bo : (1, D) f32.
    q_rows   : if set, only the first q_rows query rows are computed
               (CLS-only attention for 'first' pooling).
    """
    S, D = x.shape
    dh = D // heads
    f32, bf16 = jnp.float32, jnp.bfloat16

    # One full-width, full-depth (K=D, N=3D) MXU matmul for Q, K and V.
    qkv = jnp.dot(x, wqkv, preferred_element_type=f32) + bqkv          # (S, 3D)
    sq = S if q_rows is None else q_rows
    q_all = qkv[:sq, 0:D]
    k_all = qkv[:, D:2 * D]
    v_all = qkv[:, 2 * D:3 * D]

    # Per-head scores / softmax / context via static lane slices (no activation
    # broadcast, no (heads, S, D) intermediates).
    ctx_pieces = []
    for h in range(heads):
        lo, hi = h * dh, (h + 1) * dh
        qh = q_all[:, lo:hi].astype(bf16)                              # (sq, dh)
        kh = k_all[:, lo:hi].astype(bf16)                              # (S, dh)
        vh = v_all[:, lo:hi].astype(bf16)                              # (S, dh)
        s = jnp.dot(qh, kh.T, preferred_element_type=f32) + add_mask   # (sq, S)
        m = jnp.max(s, axis=-1, keepdims=True)
        e = jnp.exp(s - m)
        p = e * pl.reciprocal(jnp.sum(e, axis=-1, keepdims=True), approx=True)
        ctx_pieces.append(
            jnp.dot(p.astype(bf16), vh, preferred_element_type=f32).astype(bf16))

    # Fuse output projection with the head merge: (sq, D) @ (D, D), K = D.
    ctx = jnp.concatenate(ctx_pieces, axis=-1) if heads > 1 else ctx_pieces[0]
    return jnp.dot(ctx, wo, preferred_element_type=f32) + bo           # (sq, D) f32


# ------------------------------ fused kernel --------------------------------

def _fused_layer_kernel(
        idx_ref, hid_ref, mask_ref,
        # transformer layer weights (stacked over L, selected by idx):
        wqkv_ref, bqkv_ref, wo_ref, bo_ref,
        g1_ref, be1_ref, w1_ref, bf1_ref, w2_ref, bf2_ref, g2_ref, be2_ref,
        # AttMiniClassifier weights (stacked over L):
        cw0_ref, cb0_ref, cwqkv_ref, cbqkv_ref, cwo_ref, cbo_ref,
        cw1_ref, cb1_ref, cw2_ref, cb2_ref,
        # outputs:
        hid_out_ref, probs_ref,
        *, heads, cla_heads):
    del idx_ref  # consumed by the BlockSpec index_maps (layer selection)
    f32, bf16 = jnp.float32, jnp.bfloat16
    x = hid_ref[0]                         # (S, H) bf16
    add_mask = mask_ref[0]                 # (1, S) f32

    # --- TransformerLayer: self-attention + add&norm + FFN + add&norm ---
    att = _attention(x, add_mask, wqkv_ref[0], bqkv_ref[0],
                     wo_ref[0], bo_ref[0], heads)
    inter = _layer_norm(att + x.astype(f32), g1_ref[0], be1_ref[0],
                        use_pl_recip=True)
    h1 = _gelu(jnp.dot(inter.astype(bf16), w1_ref[0],
                       preferred_element_type=f32) + bf1_ref[0])
    ffn = jnp.dot(h1.astype(bf16), w2_ref[0],
                  preferred_element_type=f32) + bf2_ref[0]
    out = _layer_norm(ffn + inter, g2_ref[0], be2_ref[0], use_pl_recip=True)
    hid_out_ref[0] = out.astype(hid_out_ref.dtype)

    # --- AttMiniClassifier (pooling == 'first': only query row 0 needed) ---
    hbf = out.astype(bf16)
    c0 = jnp.tanh(jnp.dot(hbf, cw0_ref[0], preferred_element_type=f32)
                  + cb0_ref[0])                       # (S, C) f32
    pooled = _attention(c0.astype(bf16), add_mask,
                        cwqkv_ref[0], cbqkv_ref[0], cwo_ref[0], cbo_ref[0],
                        cla_heads, q_rows=1)          # (1, C) f32
    o1 = jnp.tanh(jnp.dot(pooled.astype(bf16), cw1_ref[0],
                          preferred_element_type=f32) + cb1_ref[0])
    logits = jnp.dot(o1.astype(bf16), cw2_ref[0],
                     preferred_element_type=f32) + cb2_ref[0]          # (1, labels)

    # in-kernel softmax -> the wrapper only computes the entropy scalar.
    m = jnp.max(logits, axis=-1, keepdims=True)
    e = jnp.exp(logits - m)
    probs_ref[...] = e / jnp.sum(e, axis=-1, keepdims=True)


# ------------------------ optional-feature probing ---------------------------

@lru_cache(maxsize=None)
def _optional_pallas_features():
    """Probe (a) pl.Buffered(1) single-buffered weight specs and (b)
    input_output_aliases alongside scalar prefetch; fall back gracefully if the
    installed jaxlib rejects either, so the model always runs."""

    def _probe(use_buffered, use_alias):
        def k(idx_ref, x_ref, w_ref, o_ref):
            del idx_ref
            o_ref[...] = x_ref[...] + w_ref[...]

        wkw = {"pipeline_mode": pl.Buffered(1)} if use_buffered else {}
        fn = pl.pallas_call(
            k,
            out_shape=jax.ShapeDtypeStruct((1, 8, 128), jnp.float32),
            grid_spec=pltpu.PrefetchScalarGridSpec(
                num_scalar_prefetch=1,
                grid=(1,),
                in_specs=[
                    pl.BlockSpec((1, 8, 128), lambda b, i: (b, 0, 0)),
                    pl.BlockSpec((1, 8, 128), lambda b, i: (i[0], 0, 0), **wkw),
                ],
                out_specs=pl.BlockSpec((1, 8, 128), lambda b, i: (b, 0, 0))),
            input_output_aliases=({1: 0} if use_alias else {}),
        )
        out = fn(jnp.zeros((1,), jnp.int32),
                 jnp.zeros((1, 8, 128), jnp.float32),
                 jnp.ones((2, 8, 128), jnp.float32))
        return bool(jnp.allclose(jax.block_until_ready(out), 1.0))

    def _safe(use_buffered, use_alias):
        try:
            return _probe(use_buffered, use_alias)
        except Exception:
            return False

    return _safe(True, False), _safe(False, True)


# ------------------------------ pallas_call glue -----------------------------

@lru_cache(maxsize=None)
def build_fastbert_layer(B, S, H, heads, ff, C, cla_heads, labels_num, L):
    del L  # implicit in the stacked weight arrays
    buffered_ok, alias_ok = _optional_pallas_features()
    wkw = {"pipeline_mode": pl.Buffered(1)} if buffered_ok else {}

    def bspec(shape):
        n = len(shape)
        return pl.BlockSpec((1,) + tuple(shape),
                            lambda b, idx, _n=n: (b,) + (0,) * _n)

    def lp(shape):
        # Stacked (L, *shape) weights: the scalar-prefetch layer index picks the
        # block, and (if supported) the block is single-buffered because it is
        # grid-invariant within one call.
        n = len(shape)
        return pl.BlockSpec((1,) + tuple(shape),
                            lambda b, idx, _n=n: (idx[0],) + (0,) * _n,
                            **wkw)

    in_specs = [
        bspec((S, H)),                              # hidden (bf16)
        bspec((1, S)),                              # additive key mask (f32)
        lp((H, 3 * H)), lp((1, 3 * H)),             # fused Wqkv, bqkv
        lp((H, H)), lp((1, H)),                     # Wo, bo
        lp((1, H)), lp((1, H)),                     # LN1 gamma, beta
        lp((H, ff)), lp((1, ff)),                   # FFN W1, b1
        lp((ff, H)), lp((1, H)),                    # FFN W2, b2
        lp((1, H)), lp((1, H)),                     # LN2 gamma, beta
        lp((H, C)), lp((1, C)),                     # clf output_layer_0
        lp((C, 3 * C)), lp((1, 3 * C)),             # clf fused Wqkv, bqkv
        lp((C, C)), lp((1, C)),                     # clf Wo, bo
        lp((C, C)), lp((1, C)),                     # clf output_layer_1
        lp((C, labels_num)), lp((1, labels_num)),   # clf output_layer_2
    ]
    out_specs = [
        bspec((S, H)),
        pl.BlockSpec((1, labels_num), lambda b, idx: (b, 0)),
    ]

    # Explicit scoped-VMEM budget sized from the real footprint (single-buffered
    # weights + f32 activations), clamped to stay safe on v7x's 64 MiB VMEM.
    # TODO(synk): at BERT-large+/long-S sizes on v7x, tile the FFN over S /
    # add a second parallel grid axis instead of raising this limit.
    weight_bytes = 2 * (4 * H * H + 2 * H * ff + H * C + 6 * C * C
                        + C * labels_num)
    act_bytes = 4 * S * (8 * H + ff + 6 * C + 2 * S)
    vmem_limit = int(max(32 << 20, min(2 * (weight_bytes + act_bytes), 64 << 20)))

    return pl.pallas_call(
        functools.partial(_fused_layer_kernel, heads=heads, cla_heads=cla_heads),
        out_shape=(jax.ShapeDtypeStruct((B, S, H), jnp.bfloat16),
                   jax.ShapeDtypeStruct((B, labels_num), jnp.float32)),
        grid_spec=pltpu.PrefetchScalarGridSpec(
            num_scalar_prefetch=1,
            grid=(B,),
            in_specs=in_specs,
            out_specs=out_specs),
        compiler_params=pltpu.CompilerParams(
            dimension_semantics=("parallel",),
            vmem_limit_bytes=vmem_limit),
        # donate the hidden-state input buffer to the hidden-state output
        # (input index 1: [0]=layer idx scalar, [1]=hidden).
        input_output_aliases=({1: 0} if alias_ok else {}),
    )


# ------------------------------ parameters ----------------------------------

def init_params(key, vocab, S, H, heads, ff, L, C, cla_heads, labels_num):
    # Mirrors `p.data.normal_(0, 0.02)` for non-gamma/beta params;
    # gamma = ones, beta = zeros.  Weights stored as (in, out): y = x @ W + b.
    n_keys = 3 + L * (12 + 14)
    keys = iter(jax.random.split(key, n_keys))
    nrm = lambda shape: 0.02 * jax.random.normal(next(keys), shape, jnp.float32)
    params = {
        'word_emb': nrm((vocab, H)),
        'pos_emb': nrm((S, H)),
        'seg_emb': nrm((3, H)),
        'emb_gamma': jnp.ones((H,), jnp.float32),
        'emb_beta': jnp.zeros((H,), jnp.float32),
        'heads': heads, 'ff': ff, 'cla_hidden': C, 'cla_heads': cla_heads,
        'labels_num': labels_num,
    }
    layers = []
    for _ in range(L):
        layers.append((
            nrm((H, H)), nrm((1, H)),      # Wq, bq
            nrm((H, H)), nrm((1, H)),      # Wk, bk
            nrm((H, H)), nrm((1, H)),      # Wv, bv
            nrm((H, H)), nrm((1, H)),      # Wo, bo
            jnp.ones((1, H), jnp.float32), jnp.zeros((1, H), jnp.float32),  # LN1
            nrm((H, ff)), nrm((1, ff)),    # FFN W1, b1
            nrm((ff, H)), nrm((1, H)),     # FFN W2, b2
            jnp.ones((1, H), jnp.float32), jnp.zeros((1, H), jnp.float32),  # LN2
        ))
    params['layers'] = layers
    clfs = []
    for _ in range(L):
        clfs.append((
            nrm((H, C)), nrm((1, C)),                    # output_layer_0
            nrm((C, C)), nrm((1, C)),                    # att Wq, bq
            nrm((C, C)), nrm((1, C)),                    # att Wk, bk
            nrm((C, C)), nrm((1, C)),                    # att Wv, bv
            nrm((C, C)), nrm((1, C)),                    # att Wo, bo
            nrm((C, C)), nrm((1, C)),                    # output_layer_1
            nrm((C, labels_num)), nrm((1, labels_num)),  # output_layer_2
        ))
    params['classifiers'] = clfs
    return params


def prepare_params(params):
    """One-time parameter prep: fuse Q/K/V into a single (D, 3D) bf16 matrix
    with 1/sqrt(dh) folded into the Q columns, keep Wo unsplit, cast weight
    matrices to bf16 and stack per-layer params along a leading layer axis."""
    heads = params['heads']
    cla_heads = params['cla_heads']
    H = params['word_emb'].shape[1]
    C = params['cla_hidden']
    bf16, f32 = jnp.bfloat16, jnp.float32
    bf = lambda w: w.astype(bf16)

    def fuse_qkv(wq, bq, wk, bk, wv, bv, dh):
        s = 1.0 / math.sqrt(dh)
        wqkv = jnp.concatenate([wq * s, wk, wv], axis=1)       # (D, 3D)
        bqkv = jnp.concatenate([bq * s, bk, bv], axis=1)       # (1, 3D)
        return wqkv.astype(bf16), bqkv.astype(f32)

    dh, dc = H // heads, C // cla_heads

    layers = []
    for (wq, bq, wk, bk, wv, bv, wo, bo,
         g1, be1, w1, b1, w2, b2, g2, be2) in params['layers']:
        wqkv, bqkv = fuse_qkv(wq, bq, wk, bk, wv, bv, dh)
        layers.append((wqkv, bqkv, bf(wo), bo, g1, be1,
                       bf(w1), b1, bf(w2), b2, g2, be2))

    clfs = []
    for (w0, b0, wq, bq, wk, bk, wv, bv, wo, bo,
         w1, b1, w2, b2) in params['classifiers']:
        cwqkv, cbqkv = fuse_qkv(wq, bq, wk, bk, wv, bv, dc)
        clfs.append((bf(w0), b0, cwqkv, cbqkv, bf(wo), bo,
                     bf(w1), b1, bf(w2), b2))

    stack = lambda rows: tuple(jnp.stack(cols) for cols in zip(*rows))
    return {
        'word_emb': params['word_emb'],
        'pos_emb': params['pos_emb'],
        'seg_emb': params['seg_emb'],
        'emb_gamma': params['emb_gamma'],
        'emb_beta': params['emb_beta'],
        'layers': stack(layers),
        'classifiers': stack(clfs),
    }


# ------------------------------ forward (fast infer) -------------------------

@lru_cache(maxsize=None)
def _build_forward(B, S, H, heads, ff, C, cla_heads, labels_num, layers_num):
    layer_fn = build_fastbert_layer(B, S, H, heads, ff, C, cla_heads,
                                    labels_num, layers_num)
    log_labels = math.log(float(labels_num))

    def forward(prep, ids, seg, speed):
        # --- BertEmbedding: word + position + segment, LayerNorm (glue) ---
        word = jnp.take(prep['word_emb'], ids, axis=0)           # (B, S, H)
        pos = prep['pos_emb'][None, :S, :]                       # (1, S, H)
        segm = jnp.take(prep['seg_emb'], seg, axis=0)            # (B, S, H)
        emb = _layer_norm(word + pos + segm,
                          prep['emb_gamma'], prep['emb_beta'])
        hidden0 = emb.astype(jnp.bfloat16)

        # _mask_transfer as a (B, 1, S) additive *key* mask (broadcast over
        # query rows inside the kernel instead of DMA-ing a (B,1,S,S) tensor).
        key_mask = (seg > 0).astype(jnp.float32)
        add_mask = ((1.0 - key_mask) * -10000.0)[:, None, :]

        layer_p = prep['layers']
        clf_p = prep['classifiers']

        # Early-exit loop fully on device; one fused pallas_call per iteration.
        def body(carry):
            i, hidden, _probs, _ = carry
            idx = jnp.reshape(i, (1,)).astype(jnp.int32)
            hidden, probs = layer_fn(idx, hidden, add_mask, *layer_p, *clf_p)
            # calc_uncertainty with N=None: normalized entropy of sample 0
            # (the reference _fast_infer runs with batch size 1).
            # TODO(synk): uncertainty_N (top-N entropy) variant not implemented.
            p0 = probs[0]
            unc = jnp.sum(p0 * jnp.log(p0)) / (-log_labels)
            return (i + 1, hidden, probs, unc)

        def cond(carry):
            i, _, _, unc = carry
            return jnp.logical_and(i < layers_num, unc >= speed)

        init = (jnp.int32(0), hidden0,
                jnp.zeros((B, labels_num), jnp.float32),
                jnp.array(jnp.inf, jnp.float32))
        exec_layers, _, probs, _ = jax.lax.while_loop(cond, body, init)
        return probs, exec_layers

    return jax.jit(forward)


def fastbert_forward(prep, config, ids, seg, id2label, speed=0.0):
    """FastBERT._fast_infer equivalent on prepared (stacked, bf16) params.

    TODO(synk): BertTokenizer / Vocab string preprocessing has no Pallas
    equivalent; token ids and segment mask are provided directly.
    """
    B, S = ids.shape
    H = prep['word_emb'].shape[1]
    fwd = _build_forward(B, S, H, config['heads'], config['ff'],
                         config['cla_hidden'], config['cla_heads'],
                         config['labels_num'], config['layers_num'])
    probs, exec_layers = fwd(prep, ids, seg, jnp.float32(speed))
    probs = jax.block_until_ready(probs)
    label_id = int(jnp.argmax(probs[0]))
    return id2label[label_id], int(exec_layers), probs


# ----------------------------------- main ------------------------------------

if __name__ == "__main__":
    # Small, layout-friendly shapes: dh = dc = 64 (as in BERT-base heads) and
    # cla_hidden/cla_heads = 128/2 exactly match AttMiniClassifier defaults.
    B, S, H, HEADS, FF, LAYERS = 1, 16, 128, 2, 256, 3
    CLA_HIDDEN, CLA_HEADS = 128, 2
    VOCAB = 64
    labels = ["negative", "neutral", "positive", "other"]
    id2label = {i: l for i, l in enumerate(labels)}

    key = jax.random.PRNGKey(0)
    pkey, ikey = jax.random.split(key)
    params = init_params(pkey, VOCAB, S, H, HEADS, FF, LAYERS,
                         CLA_HIDDEN, CLA_HEADS, len(labels))
    prep = prepare_params(params)
    config = dict(heads=HEADS, ff=FF, cla_hidden=CLA_HIDDEN,
                  cla_heads=CLA_HEADS, labels_num=len(labels),
                  layers_num=LAYERS)

    # Deterministic synthetic "tokenized sentence": [CLS] + tokens, padded.
    valid_len = 10
    ids = jax.random.randint(ikey, (B, S), 1, VOCAB, dtype=jnp.int32)
    ids = ids.at[:, valid_len:].set(0)
    seg = jnp.where(jnp.arange(S)[None, :] < valid_len, 1, 0).astype(jnp.int32)
    seg = jnp.broadcast_to(seg, (B, S))

    label, exec_layers, probs = fastbert_forward(
        prep, config, ids, seg, id2label, speed=0.3)
    probs = jax.block_until_ready(probs)

    # Light sanity checks (probs is a valid distribution, layer count sane).
    psum = float(jnp.sum(probs[0]))
    assert bool(jnp.all(jnp.isfinite(probs))) and abs(psum - 1.0) < 5e-2, \
        "classifier output is not a valid probability distribution"
    assert 1 <= exec_layers <= LAYERS

    print("KERNEL_OK")
</pallas_src>

<mosaic_0001>
module attributes {stable_mosaic.version = 11 : i64} {
  func.func @k(%arg0: i32, %arg1: memref<1xi32, #tpu.memory_space<smem>>, %arg2: memref<1x8x128xf32, #tpu.memory_space<vmem>>, %arg3: memref<1x8x128xf32, #tpu.memory_space<vmem>>, %arg4: memref<1x8x128xf32, #tpu.memory_space<vmem>>) attributes {dimension_semantics = [#tpu.dimension_semantics<arbitrary>], iteration_bounds = array<i64: 1>, scalar_prefetch = 1 : i64, scratch_operands = 0 : i64, tpu.core_type = #tpu.core_type<tc>, window_params = [{transform_indices = @transform_0, window_bounds = array<i64: 1, 8, 128>}, {pipeline_mode = #tpu.pipeline_mode<synchronous>, transform_indices = @transform_1, window_bounds = array<i64: 1, 8, 128>}, {transform_indices = @transform_2, window_bounds = array<i64: 1, 8, 128>}]} {
    %c0 = arith.constant 0 : index
    %c0_0 = arith.constant 0 : index
    %c0_1 = arith.constant 0 : index
    %0 = vector.load %arg2[%c0, %c0_0, %c0_1] : memref<1x8x128xf32, #tpu.memory_space<vmem>>, vector<1x8x128xf32>
    %c0_2 = arith.constant 0 : index
    %c0_3 = arith.constant 0 : index
    %c0_4 = arith.constant 0 : index
    %1 = vector.load %arg3[%c0_2, %c0_3, %c0_4] : memref<1x8x128xf32, #tpu.memory_space<vmem>>, vector<1x8x128xf32>
    %2 = arith.addf %0, %1 : vector<1x8x128xf32>
    %c0_5 = arith.constant 0 : index
    %c0_6 = arith.constant 0 : index
    %c0_7 = arith.constant 0 : index
    %3 = vector.load %arg4[%c0_5, %c0_6, %c0_7] : memref<1x8x128xf32, #tpu.memory_space<vmem>>, vector<1x8x128xf32>
    tpu.vector_store %arg4[%c0_5, %c0_6, %c0_7], %2 {strides = array<i32>} : memref<1x8x128xf32, #tpu.memory_space<vmem>>, vector<1x8x128xf32>,
    return
  }
  func.func @transform_0(%arg0: i32, %arg1: memref<1xi32, #tpu.memory_space<smem>>) -> (i32, i32, i32) {
    %c0_i32 = arith.constant 0 : i32
    %c0_i32_0 = arith.constant 0 : i32
    %c0_i32_1 = arith.constant 0 : i32
    return %arg0, %c0_i32, %c0_i32_0 : i32, i32, i32
  }
  func.func @transform_1(%arg0: i32, %arg1: memref<1xi32, #tpu.memory_space<smem>>) -> (i32, i32, i32) {
    %c0 = arith.constant 0 : index
    %0 = memref.load %arg1[%c0] : memref<1xi32, #tpu.memory_space<smem>>
    %c0_i32 = arith.constant 0 : i32
    %c0_i32_0 = arith.constant 0 : i32
    %c0_i32_1 = arith.constant 0 : i32
    return %0, %c0_i32, %c0_i32_0 : i32, i32, i32
  }
  func.func @transform_2(%arg0: i32, %arg1: memref<1xi32, #tpu.memory_space<smem>>) -> (i32, i32, i32) {
    %c0_i32 = arith.constant 0 : i32
    %c0_i32_0 = arith.constant 0 : i32
    %c0_i32_1 = arith.constant 0 : i32
    return %arg0, %c0_i32, %c0_i32_0 : i32, i32, i32
  }
}

module attributes {stable_mosaic.version = 11 : i64} {
  func.func @k(%arg0: i32, %arg1: memref<1xi32, #tpu.memory_space<smem>>, %arg2: memref<1x8x128xf32, #tpu.memory_space<vmem>>, %arg3: memref<1x8x128xf32, #tpu.memory_space<vmem>>, %arg4: memref<1x8x128xf32, #tpu.memory_space<vmem>>) attributes {dimension_semantics = [#tpu.dimension_semantics<arbitrary>], iteration_bounds = array<i64: 1>, scalar_prefetch = 1 : i64, scratch_operands = 0 : i64, tpu.core_type = #tpu.core_type<tc>, window_params = [{transform_indices = @transform_0, window_bounds = array<i64: 1, 8, 128>}, {transform_indices = @transform_1, window_bounds = array<i64: 1, 8, 128>}, {transform_indices = @transform_2, window_bounds = array<i64: 1, 8, 128>}]} {
    %c0 = arith.constant 0 : index
    %c0_0 = arith.constant 0 : index
    %c0_1 = arith.constant 0 : index
    %0 = vector.load %arg2[%c0, %c0_0, %c0_1] : memref<1x8x128xf32, #tpu.memory_space<vmem>>, vector<1x8x128xf32>
    %c0_2 = arith.constant 0 : index
    %c0_3 = arith.constant 0 : index
    %c0_4 = arith.constant 0 : index
    %1 = vector.load %arg3[%c0_2, %c0_3, %c0_4] : memref<1x8x128xf32, #tpu.memory_space<vmem>>, vector<1x8x128xf32>
    %2 = arith.addf %0, %1 : vector<1x8x128xf32>
    %c0_5 = arith.constant 0 : index
    %c0_6 = arith.constant 0 : index
    %c0_7 = arith.constant 0 : index
    %3 = vector.load %arg4[%c0_5, %c0_6, %c0_7] : memref<1x8x128xf32, #tpu.memory_space<vmem>>, vector<1x8x128xf32>
    tpu.vector_store %arg4[%c0_5, %c0_6, %c0_7], %2 {strides = array<i32>} : memref<1x8x128xf32, #tpu.memory_space<vmem>>, vector<1x8x128xf32>,
    return
  }
  func.func @transform_0(%arg0: i32, %arg1: memref<1xi32, #tpu.memory_space<smem>>) -> (i32, i32, i32) {
    %c0_i32 = arith.constant 0 : i32
    %c0_i32_0 = arith.constant 0 : i32
    %c0_i32_1 = arith.constant 0 : i32
    return %arg0, %c0_i32, %c0_i32_0 : i32, i32, i32
  }
  func.func @transform_1(%arg0: i32, %arg1: memref<1xi32, #tpu.memory_space<smem>>) -> (i32, i32, i32) {
    %c0 = arith.constant 0 : index
    %0 = memref.load %arg1[%c0] : memref<1xi32, #tpu.memory_space<smem>>
    %c0_i32 = arith.constant 0 : i32
    %c0_i32_0 = arith.constant 0 : i32
    %c0_i32_1 = arith.constant 0 : i32
    return %0, %c0_i32, %c0_i32_0 : i32, i32, i32
  }
  func.func @transform_2(%arg0: i32, %arg1: memref<1xi32, #tpu.memory_space<smem>>) -> (i32, i32, i32) {
    %c0_i32 = arith.constant 0 : i32
    %c0_i32_0 = arith.constant 0 : i32
    %c0_i32_1 = arith.constant 0 : i32
    return %arg0, %c0_i32, %c0_i32_0 : i32, i32, i32
  }
}

module attributes {stable_mosaic.version = 11 : i64} {
  func.func @_fused_layer_kernel(%arg0: i32, %arg1: memref<1xi32, #tpu.memory_space<smem>>, %arg2: memref<1x16x128xbf16, #tpu.memory_space<vmem>>, %arg3: memref<1x1x16xf32, #tpu.memory_space<vmem>>, %arg4: memref<1x128x384xbf16, #tpu.memory_space<vmem>>, %arg5: memref<1x1x384xf32, #tpu.memory_space<vmem>>, %arg6: memref<1x128x128xbf16, #tpu.memory_space<vmem>>, %arg7: memref<1x1x128xf32, #tpu.memory_space<vmem>>, %arg8: memref<1x1x128xf32, #tpu.memory_space<vmem>>, %arg9: memref<1x1x128xf32, #tpu.memory_space<vmem>>, %arg10: memref<1x128x256xbf16, #tpu.memory_space<vmem>>, %arg11: memref<1x1x256xf32, #tpu.memory_space<vmem>>, %arg12: memref<1x256x128xbf16, #tpu.memory_space<vmem>>, %arg13: memref<1x1x128xf32, #tpu.memory_space<vmem>>, %arg14: memref<1x1x128xf32, #tpu.memory_space<vmem>>, %arg15: memref<1x1x128xf32, #tpu.memory_space<vmem>>, %arg16: memref<1x128x128xbf16, #tpu.memory_space<vmem>>, %arg17: memref<1x1x128xf32, #tpu.memory_space<vmem>>, %arg18: memref<1x128x384xbf16, #tpu.memory_space<vmem>>, %arg19: memref<1x1x384xf32, #tpu.memory_space<vmem>>, %arg20: memref<1x128x128xbf16, #tpu.memory_space<vmem>>, %arg21: memref<1x1x128xf32, #tpu.memory_space<vmem>>, %arg22: memref<1x128x128xbf16, #tpu.memory_space<vmem>>, %arg23: memref<1x1x128xf32, #tpu.memory_space<vmem>>, %arg24: memref<1x128x4xbf16, #tpu.memory_space<vmem>>, %arg25: memref<1x1x4xf32, #tpu.memory_space<vmem>>, %arg26: memref<1x16x128xbf16, #tpu.memory_space<vmem>>, %arg27: memref<1x4xf32, #tpu.memory_space<vmem>>) attributes {dimension_semantics = [#tpu.dimension_semantics<parallel>], iteration_bounds = array<i64: 1>, scalar_prefetch = 1 : i64, scratch_operands = 0 : i64, tpu.core_type = #tpu.core_type<tc>, window_params = [{transform_indices = @transform_0, window_bounds = array<i64: 1, 16, 128>}, {transform_indices = @transform_1, window_bounds = array<i64: 1, 1, 16>}, {transform_indices = @transform_2, window_bounds = array<i64: 1, 128, 384>}, {transform_indices = @transform_3, window_bounds = array<i64: 1, 1, 384>}, {transform_indices = @transform_4, window_bounds = array<i64: 1, 128, 128>}, {transform_indices = @transform_5, window_bounds = array<i64: 1, 1, 128>}, {transform_indices = @transform_6, window_bounds = array<i64: 1, 1, 128>}, {transform_indices = @transform_7, window_bounds = array<i64: 1, 1, 128>}, {transform_indices = @transform_8, window_bounds = array<i64: 1, 128, 256>}, {transform_indices = @transform_9, window_bounds = array<i64: 1, 1, 256>}, {transform_indices = @transform_10, window_bounds = array<i64: 1, 256, 128>}, {transform_indices = @transform_11, window_bounds = array<i64: 1, 1, 128>}, {transform_indices = @transform_12, window_bounds = array<i64: 1, 1, 128>}, {transform_indices = @transform_13, window_bounds = array<i64: 1, 1, 128>}, {transform_indices = @transform_14, window_bounds = array<i64: 1, 128, 128>}, {transform_indices = @transform_15, window_bounds = array<i64: 1, 1, 128>}, {transform_indices = @transform_16, window_bounds = array<i64: 1, 128, 384>}, {transform_indices = @transform_17, window_bounds = array<i64: 1, 1, 384>}, {transform_indices = @transform_18, window_bounds = array<i64: 1, 128, 128>}, {transform_indices = @transform_19, window_bounds = array<i64: 1, 1, 128>}, {transform_indices = @transform_20, window_bounds = array<i64: 1, 128, 128>}, {transform_indices = @transform_21, window_bounds = array<i64: 1, 1, 128>}, {transform_indices = @transform_22, window_bounds = array<i64: 1, 128, 4>}, {transform_indices = @transform_23, window_bounds = array<i64: 1, 1, 4>}, {transform_indices = @transform_24, window_bounds = array<i64: 1, 16, 128>}, {transform_indices = @transform_25, window_bounds = array<i64: 1, 4>}]} {
    %c0 = arith.constant 0 : index
    %c0_0 = arith.constant 0 : index
    %c0_1 = arith.constant 0 : index
    %0 = vector.load %arg2[%c0, %c0_0, %c0_1] : memref<1x16x128xbf16, #tpu.memory_space<vmem>>, vector<1x16x128xbf16>
    %1 = vector.shape_cast %0 : vector<1x16x128xbf16> to vector<16x128xbf16>
    %c0_2 = arith.constant 0 : index
    %c0_3 = arith.constant 0 : index
    %c0_4 = arith.constant 0 : index
    %2 = vector.load %arg3[%c0_2, %c0_3, %c0_4] : memref<1x1x16xf32, #tpu.memory_space<vmem>>, vector<1x1x16xf32>
    %3 = vector.shape_cast %2 : vector<1x1x16xf32> to vector<1x16xf32>
    %c0_5 = arith.constant 0 : index
    %c0_6 = arith.constant 0 : index
    %c0_7 = arith.constant 0 : index
    %4 = vector.load %arg4[%c0_5, %c0_6, %c0_7] : memref<1x128x384xbf16, #tpu.memory_space<vmem>>, vector<1x128x384xbf16>
    %5 = vector.shape_cast %4 : vector<1x128x384xbf16> to vector<128x384xbf16>
    %c0_8 = arith.constant 0 : index
    %c0_9 = arith.constant 0 : index
    %c0_10 = arith.constant 0 : index
    %6 = vector.load %arg5[%c0_8, %c0_9, %c0_10] : memref<1x1x384xf32, #tpu.memory_space<vmem>>, vector<1x1x384xf32>
    %7 = vector.shape_cast %6 : vector<1x1x384xf32> to vector<1x384xf32>
    %c0_11 = arith.constant 0 : index
    %c0_12 = arith.constant 0 : index
    %c0_13 = arith.constant 0 : index
    %8 = vector.load %arg6[%c0_11, %c0_12, %c0_13] : memref<1x128x128xbf16, #tpu.memory_space<vmem>>, vector<1x128x128xbf16>
    %9 = vector.shape_cast %8 : vector<1x128x128xbf16> to vector<128x128xbf16>
    %c0_14 = arith.constant 0 : index
    %c0_15 = arith.constant 0 : index
    %c0_16 = arith.constant 0 : index
    %10 = vector.load %arg7[%c0_14, %c0_15, %c0_16] : memref<1x1x128xf32, #tpu.memory_space<vmem>>, vector<1x1x128xf32>
    %11 = vector.shape_cast %10 : vector<1x1x128xf32> to vector<1x128xf32>
    %cst = arith.constant dense<0.000000e+00> : vector<16x384xf32>
    %12 = tpu.matmul %1, %5, %cst {dimension_numbers = #tpu.dot_dimension_numbers<[1], [0], [0], [1], [0, 0, 1, 1], [], []>} : vector<16x128xbf16>, vector<128x384xbf16>, vector<16x384xf32> -> vector<16x384xf32>
    %13 = vector.broadcast %7 : vector<1x384xf32> to vector<16x384xf32>
    %14 = arith.addf %12, %13 : vector<16x384xf32>
    %15 = vector.extract_strided_slice %14 {offsets = [0, 0], sizes = [16, 128], strides = [1, 1]} : vector<16x384xf32> to vector<16x128xf32>
    %16 = vector.extract_strided_slice %14 {offsets = [0, 128], sizes = [16, 128], strides = [1, 1]} : vector<16x384xf32> to vector<16x128xf32>
    %17 = vector.extract_strided_slice %14 {offsets = [0, 256], sizes = [16, 128], strides = [1, 1]} : vector<16x384xf32> to vector<16x128xf32>
    %18 = vector.extract_strided_slice %15 {offsets = [0, 0], sizes = [16, 64], strides = [1, 1]} : vector<16x128xf32> to vector<16x64xf32>
    %19 = arith.truncf %18 : vector<16x64xf32> to vector<16x64xbf16>
    %20 = vector.extract_strided_slice %16 {offsets = [0, 0], sizes = [16, 64], strides = [1, 1]} : vector<16x128xf32> to vector<16x64xf32>
    %21 = arith.truncf %20 : vector<16x64xf32> to vector<16x64xbf16>
    %22 = vector.extract_strided_slice %17 {offsets = [0, 0], sizes = [16, 64], strides = [1, 1]} : vector<16x128xf32> to vector<16x64xf32>
    %23 = arith.truncf %22 : vector<16x64xf32> to vector<16x64xbf16>
    %24 = tpu.transpose %21, [1, 0] : vector<16x64xbf16> -> vector<64x16xbf16>
    %cst_17 = arith.constant dense<0.000000e+00> : vector<16x16xf32>
    %25 = tpu.matmul %19, %24, %cst_17 {dimension_numbers = #tpu.dot_dimension_numbers<[1], [0], [0], [1], [0, 0, 1, 1], [], []>} : vector<16x64xbf16>, vector<64x16xbf16>, vector<16x16xf32> -> vector<16x16xf32>
    %26 = vector.broadcast %3 : vector<1x16xf32> to vector<16x16xf32>
    %27 = arith.addf %25, %26 : vector<16x16xf32>
    %cst_18 = arith.constant dense<0xFF800000> : vector<16xf32>
    %28 = vector.multi_reduction <maximumf>, %27, %cst_18 [1] : vector<16x16xf32> to vector<16xf32>
    %29 = vector.shape_cast %28 : vector<16xf32> to vector<16x1xf32>
    %30 = vector.broadcast %29 : vector<16x1xf32> to vector<16x16xf32>
    %31 = arith.subf %27, %30 : vector<16x16xf32>
    %32 = math.exp %31 : vector<16x16xf32>
    %cst_19 = arith.constant dense<0.000000e+00> : vector<16xf32>
    %33 = vector.multi_reduction <add>, %32, %cst_19 [1] : vector<16x16xf32> to vector<16xf32>
    %34 = vector.shape_cast %33 : vector<16xf32> to vector<16x1xf32>
    %35 = tpu.reciprocal %34 {approx = true} : vector<16x1xf32> -> vector<16x1xf32>
    %36 = vector.broadcast %35 : vector<16x1xf32> to vector<16x16xf32>
    %37 = arith.mulf %32, %36 : vector<16x16xf32>
    %38 = arith.truncf %37 : vector<16x16xf32> to vector<16x16xbf16>
    %cst_20 = arith.constant dense<0.000000e+00> : vector<16x64xf32>
    %39 = tpu.matmul %38, %23, %cst_20 {dimension_numbers = #tpu.dot_dimension_numbers<[1], [0], [0], [1], [0, 0, 1, 1], [], []>} : vector<16x16xbf16>, vector<16x64xbf16>, vector<16x64xf32> -> vector<16x64xf32>
    %40 = arith.truncf %39 : vector<16x64xf32> to vector<16x64xbf16>
    %41 = vector.extract_strided_slice %15 {offsets = [0, 64], sizes = [16, 64], strides = [1, 1]} : vector<16x128xf32> to vector<16x64xf32>
    %42 = arith.truncf %41 : vector<16x64xf32> to vector<16x64xbf16>
    %43 = vector.extract_strided_slice %16 {offsets = [0, 64], sizes = [16, 64], strides = [1, 1]} : vector<16x128xf32> to vector<16x64xf32>
    %44 = arith.truncf %43 : vector<16x64xf32> to vector<16x64xbf16>
    %45 = vector.extract_strided_slice %17 {offsets = [0, 64], sizes = [16, 64], strides = [1, 1]} : vector<16x128xf32> to vector<16x64xf32>
    %46 = arith.truncf %45 : vector<16x64xf32> to vector<16x64xbf16>
    %47 = tpu.transpose %44, [1, 0] : vector<16x64xbf16> -> vector<64x16xbf16>
    %cst_21 = arith.constant dense<0.000000e+00> : vector<16x16xf32>
    %48 = tpu.matmul %42, %47, %cst_21 {dimension_numbers = #tpu.dot_dimension_numbers<[1], [0], [0], [1], [0, 0, 1, 1], [], []>} : vector<16x64xbf16>, vector<64x16xbf16>, vector<16x16xf32> -> vector<16x16xf32>
    %49 = vector.broadcast %3 : vector<1x16xf32> to vector<16x16xf32>
    %50 = arith.addf %48, %49 : vector<16x16xf32>
    %cst_22 = arith.constant dense<0xFF800000> : vector<16xf32>
    %51 = vector.multi_reduction <maximumf>, %50, %cst_22 [1] : vector<16x16xf32> to vector<16xf32>
    %52 = vector.shape_cast %51 : vector<16xf32> to vector<16x1xf32>
    %53 = vector.broadcast %52 : vector<16x1xf32> to vector<16x16xf32>
    %54 = arith.subf %50, %53 : vector<16x16xf32>
    %55 = math.exp %54 : vector<16x16xf32>
    %cst_23 = arith.constant dense<0.000000e+00> : vector<16xf32>
    %56 = vector.multi_reduction <add>, %55, %cst_23 [1] : vector<16x16xf32> to vector<16xf32>
    %57 = vector.shape_cast %56 : vector<16xf32> to vector<16x1xf32>
    %58 = tpu.reciprocal %57 {approx = true} : vector<16x1xf32> -> vector<16x1xf32>
    %59 = vector.broadcast %58 : vector<16x1xf32> to vector<16x16xf32>
    %60 = arith.mulf %55, %59 : vector<16x16xf32>
    %61 = arith.truncf %60 : vector<16x16xf32> to vector<16x16xbf16>
    %cst_24 = arith.constant dense<0.000000e+00> : vector<16x64xf32>
    %62 = tpu.matmul %61, %46, %cst_24 {dimension_numbers = #tpu.dot_dimension_numbers<[1], [0], [0], [1], [0, 0, 1, 1], [], []>} : vector<16x16xbf16>, vector<16x64xbf16>, vector<16x64xf32> -> vector<16x64xf32>
    %63 = arith.truncf %62 : vector<16x64xf32> to vector<16x64xbf16>
    %64 = tpu.concatenate %40, %63 in 1 : vector<16x64xbf16>, vector<16x64xbf16> -> vector<16x128xbf16>
    %cst_25 = arith.constant dense<0.000000e+00> : vector<16x128xf32>
    %65 = tpu.matmul %64, %9, %cst_25 {dimension_numbers = #tpu.dot_dimension_numbers<[1], [0], [0], [1], [0, 0, 1, 1], [], []>} : vector<16x128xbf16>, vector<128x128xbf16>, vector<16x128xf32> -> vector<16x128xf32>
    %66 = vector.broadcast %11 : vector<1x128xf32> to vector<16x128xf32>
    %67 = arith.addf %65, %66 : vector<16x128xf32>
    %68 = arith.extf %1 : vector<16x128xbf16> to vector<16x128xf32>
    %69 = arith.addf %67, %68 : vector<16x128xf32>
    %c0_26 = arith.constant 0 : index
    %c0_27 = arith.constant 0 : index
    %c0_28 = arith.constant 0 : index
    %70 = vector.load %arg8[%c0_26, %c0_27, %c0_28] : memref<1x1x128xf32, #tpu.memory_space<vmem>>, vector<1x1x128xf32>
    %71 = vector.shape_cast %70 : vector<1x1x128xf32> to vector<1x128xf32>
    %c0_29 = arith.constant 0 : index
    %c0_30 = arith.constant 0 : index
    %c0_31 = arith.constant 0 : index
    %72 = vector.load %arg9[%c0_29, %c0_30, %c0_31] : memref<1x1x128xf32, #tpu.memory_space<vmem>>, vector<1x1x128xf32>
    %73 = vector.shape_cast %72 : vector<1x1x128xf32> to vector<1x128xf32>
    %cst_32 = arith.constant dense<0.000000e+00> : vector<16xf32>
    %74 = vector.multi_reduction <add>, %69, %cst_32 [1] : vector<16x128xf32> to vector<16xf32>
    %75 = vector.shape_cast %74 : vector<16xf32> to vector<16x1xf32>
    %cst_33 = arith.constant 1.280000e+02 : f32
    %76 = vector.broadcast %cst_33 : f32 to vector<16x1xf32>
    %77 = arith.divf %75, %76 : vector<16x1xf32>
    %78 = vector.broadcast %77 : vector<16x1xf32> to vector<16x128xf32>
    %79 = arith.subf %69, %78 : vector<16x128xf32>
    %80 = arith.mulf %79, %79 : vector<16x128xf32>
    %cst_34 = arith.constant dense<0.000000e+00> : vector<16xf32>
    %81 = vector.multi_reduction <add>, %80, %cst_34 [1] : vector<16x128xf32> to vector<16xf32>
    %82 = vector.shape_cast %81 : vector<16xf32> to vector<16x1xf32>
    %cst_35 = arith.constant 1.270000e+02 : f32
    %83 = vector.broadcast %cst_35 : f32 to vector<16x1xf32>
    %84 = arith.divf %82, %83 : vector<16x1xf32>
    %85 = math.sqrt %84 : vector<16x1xf32>
    %cst_36 = arith.constant 9.99999997E-7 : f32
    %86 = vector.broadcast %cst_36 : f32 to vector<16x1xf32>
    %87 = arith.addf %85, %86 : vector<16x1xf32>
    %88 = tpu.reciprocal %87 {approx = true} : vector<16x1xf32> -> vector<16x1xf32>
    %89 = vector.broadcast %71 : vector<1x128xf32> to vector<16x128xf32>
    %90 = arith.mulf %89, %79 : vector<16x128xf32>
    %91 = vector.broadcast %88 : vector<16x1xf32> to vector<16x128xf32>
    %92 = arith.mulf %90, %91 : vector<16x128xf32>
    %93 = vector.broadcast %73 : vector<1x128xf32> to vector<16x128xf32>
    %94 = arith.addf %92, %93 : vector<16x128xf32>
    %95 = arith.truncf %94 : vector<16x128xf32> to vector<16x128xbf16>
    %c0_37 = arith.constant 0 : index
    %c0_38 = arith.constant 0 : index
    %c0_39 = arith.constant 0 : index
    %96 = vector.load %arg10[%c0_37, %c0_38, %c0_39] : memref<1x128x256xbf16, #tpu.memory_space<vmem>>, vector<1x128x256xbf16>
    %97 = vector.shape_cast %96 : vector<1x128x256xbf16> to vector<128x256xbf16>
    %cst_40 = arith.constant dense<0.000000e+00> : vector<16x256xf32>
    %98 = tpu.matmul %95, %97, %cst_40 {dimension_numbers = #tpu.dot_dimension_numbers<[1], [0], [0], [1], [0, 0, 1, 1], [], []>} : vector<16x128xbf16>, vector<128x256xbf16>, vector<16x256xf32> -> vector<16x256xf32>
    %c0_41 = arith.constant 0 : index
    %c0_42 = arith.constant 0 : index
    %c0_43 = arith.constant 0 : index
    %99 = vector.load %arg11[%c0_41, %c0_42, %c0_43] : memref<1x1x256xf32, #tpu.memory_space<vmem>>, vector<1x1x256xf32>
    %100 = vector.shape_cast %99 : vector<1x1x256xf32> to vector<1x256xf32>
    %101 = vector.broadcast %100 : vector<1x256xf32> to vector<16x256xf32>
    %102 = arith.addf %98, %101 : vector<16x256xf32>
    %cst_44 = arith.constant 5.000000e-01 : f32
    %103 = vector.broadcast %cst_44 : f32 to vector<16x256xf32>
    %104 = arith.mulf %103, %102 : vector<16x256xf32>
    %cst_45 = arith.constant 4.471500e-02 : f32
    %105 = vector.broadcast %cst_45 : f32 to vector<16x256xf32>
    %106 = arith.mulf %105, %102 : vector<16x256xf32>
    %107 = arith.mulf %106, %102 : vector<16x256xf32>
    %108 = arith.mulf %107, %102 : vector<16x256xf32>
    %109 = arith.addf %102, %108 : vector<16x256xf32>
    %cst_46 = arith.constant 0.797884583 : f32
    %110 = vector.broadcast %cst_46 : f32 to vector<16x256xf32>
    %111 = arith.mulf %110, %109 : vector<16x256xf32>
    %112 = math.tanh %111 : vector<16x256xf32>
    %cst_47 = arith.constant 1.000000e+00 : f32
    %113 = vector.broadcast %cst_47 : f32 to vector<16x256xf32>
    %114 = arith.addf %113, %112 : vector<16x256xf32>
    %115 = arith.mulf %104, %114 : vector<16x256xf32>
    %116 = arith.truncf %115 : vector<16x256xf32> to vector<16x256xbf16>
    %c0_48 = arith.constant 0 : index
    %c0_49 = arith.constant 0 : index
    %c0_50 = arith.constant 0 : index
    %117 = vector.load %arg12[%c0_48, %c0_49, %c0_50] : memref<1x256x128xbf16, #tpu.memory_space<vmem>>, vector<1x256x128xbf16>
    %118 = vector.shape_cast %117 : vector<1x256x128xbf16> to vector<256x128xbf16>
    %cst_51 = arith.constant dense<0.000000e+00> : vector<16x128xf32>
    %119 = tpu.matmul %116, %118, %cst_51 {dimension_numbers = #tpu.dot_dimension_numbers<[1], [0], [0], [1], [0, 0, 1, 1], [], []>} : vector<16x256xbf16>, vector<256x128xbf16>, vector<16x128xf32> -> vector<16x128xf32>
    %c0_52 = arith.constant 0 : index
    %c0_53 = arith.constant 0 : index
    %c0_54 = arith.constant 0 : index
    %120 = vector.load %arg13[%c0_52, %c0_53, %c0_54] : memref<1x1x128xf32, #tpu.memory_space<vmem>>, vector<1x1x128xf32>
    %121 = vector.shape_cast %120 : vector<1x1x128xf32> to vector<1x128xf32>
    %122 = vector.broadcast %121 : vector<1x128xf32> to vector<16x128xf32>
    %123 = arith.addf %119, %122 : vector<16x128xf32>
    %124 = arith.addf %123, %94 : vector<16x128xf32>
    %c0_55 = arith.constant 0 : index
    %c0_56 = arith.constant 0 : index
    %c0_57 = arith.constant 0 : index
    %125 = vector.load %arg14[%c0_55, %c0_56, %c0_57] : memref<1x1x128xf32, #tpu.memory_space<vmem>>, vector<1x1x128xf32>
    %126 = vector.shape_cast %125 : vector<1x1x128xf32> to vector<1x128xf32>
    %c0_58 = arith.constant 0 : index
    %c0_59 = arith.constant 0 : index
    %c0_60 = arith.constant 0 : index
    %127 = vector.load %arg15[%c0_58, %c0_59, %c0_60] : memref<1x1x128xf32, #tpu.memory_space<vmem>>, vector<1x1x128xf32>
    %128 = vector.shape_cast %127 : vector<1x1x128xf32> to vector<1x128xf32>
    %cst_61 = arith.constant dense<0.000000e+00> : vector<16xf32>
    %129 = vector.multi_reduction <add>, %124, %cst_61 [1] : vector<16x128xf32> to vector<16xf32>
    %130 = vector.shape_cast %129 : vector<16xf32> to vector<16x1xf32>
    %cst_62 = arith.constant 1.280000e+02 : f32
    %131 = vector.broadcast %cst_62 : f32 to vector<16x1xf32>
    %132 = arith.divf %130, %131 : vector<16x1xf32>
    %133 = vector.broadcast %132 : vector<16x1xf32> to vector<16x128xf32>
    %134 = arith.subf %124, %133 : vector<16x128xf32>
    %135 = arith.mulf %134, %134 : vector<16x128xf32>
    %cst_63 = arith.constant dense<0.000000e+00> : vector<16xf32>
    %136 = vector.multi_reduction <add>, %135, %cst_63 [1] : vector<16x128xf32> to vector<16xf32>
    %137 = vector.shape_cast %136 : vector<16xf32> to vector<16x1xf32>
    %cst_64 = arith.constant 1.270000e+02 : f32
    %138 = vector.broadcast %cst_64 : f32 to vector<16x1xf32>
    %139 = arith.divf %137, %138 : vector<16x1xf32>
    %140 = math.sqrt %139 : vector<16x1xf32>
    %cst_65 = arith.constant 9.99999997E-7 : f32
    %141 = vector.broadcast %cst_65 : f32 to vector<16x1xf32>
    %142 = arith.addf %140, %141 : vector<16x1xf32>
    %143 = tpu.reciprocal %142 {approx = true} : vector<16x1xf32> -> vector<16x1xf32>
    %144 = vector.broadcast %126 : vector<1x128xf32> to vector<16x128xf32>
    %145 = arith.mulf %144, %134 : vector<16x128xf32>
    %146 = vector.broadcast %143 : vector<16x1xf32> to vector<16x128xf32>
    %147 = arith.mulf %145, %146 : vector<16x128xf32>
    %148 = vector.broadcast %128 : vector<1x128xf32> to vector<16x128xf32>
    %149 = arith.addf %147, %148 : vector<16x128xf32>
    %150 = arith.truncf %149 : vector<16x128xf32> to vector<16x128xbf16>
    %c0_66 = arith.constant 0 : index
    %c0_67 = arith.constant 0 : index
    %c0_68 = arith.constant 0 : index
    %151 = vector.load %arg26[%c0_66, %c0_67, %c0_68] : memref<1x16x128xbf16, #tpu.memory_space<vmem>>, vector<1x16x128xbf16>
    %152 = vector.shape_cast %151 : vector<1x16x128xbf16> to vector<16x128xbf16>
    %153 = vector.shape_cast %150 : vector<16x128xbf16> to vector<1x16x128xbf16>
    tpu.vector_store %arg26[%c0_66, %c0_67, %c0_68], %153 {strides = array<i32>} : memref<1x16x128xbf16, #tpu.memory_space<vmem>>, vector<1x16x128xbf16>,
    %154 = arith.truncf %149 : vector<16x128xf32> to vector<16x128xbf16>
    %c0_69 = arith.constant 0 : index
    %c0_70 = arith.constant 0 : index
    %c0_71 = arith.constant 0 : index
    %155 = vector.load %arg16[%c0_69, %c0_70, %c0_71] : memref<1x128x128xbf16, #tpu.memory_space<vmem>>, vector<1x128x128xbf16>
    %156 = vector.shape_cast %155 : vector<1x128x128xbf16> to vector<128x128xbf16>
    %cst_72 = arith.constant dense<0.000000e+00> : vector<16x128xf32>
    %157 = tpu.matmul %154, %156, %cst_72 {dimension_numbers = #tpu.dot_dimension_numbers<[1], [0], [0], [1], [0, 0, 1, 1], [], []>} : vector<16x128xbf16>, vector<128x128xbf16>, vector<16x128xf32> -> vector<16x128xf32>
    %c0_73 = arith.constant 0 : index
    %c0_74 = arith.constant 0 : index
    %c0_75 = arith.constant 0 : index
    %158 = vector.load %arg17[%c0_73, %c0_74, %c0_75] : memref<1x1x128xf32, #tpu.memory_space<vmem>>, vector<1x1x128xf32>
    %159 = vector.shape_cast %158 : vector<1x1x128xf32> to vector<1x128xf32>
    %160 = vector.broadcast %159 : vector<1x128xf32> to vector<16x128xf32>
    %161 = arith.addf %157, %160 : vector<16x128xf32>
    %162 = math.tanh %161 : vector<16x128xf32>
    %163 = arith.truncf %162 : vector<16x128xf32> to vector<16x128xbf16>
    %c0_76 = arith.constant 0 : index
    %c0_77 = arith.constant 0 : index
    %c0_78 = arith.constant 0 : index
    %164 = vector.load %arg18[%c0_76, %c0_77, %c0_78] : memref<1x128x384xbf16, #tpu.memory_space<vmem>>, vector<1x128x384xbf16>
    %165 = vector.shape_cast %164 : vector<1x128x384xbf16> to vector<128x384xbf16>
    %c0_79 = arith.constant 0 : index
    %c0_80 = arith.constant 0 : index
    %c0_81 = arith.constant 0 : index
    %166 = vector.load %arg19[%c0_79, %c0_80, %c0_81] : memref<1x1x384xf32, #tpu.memory_space<vmem>>, vector<1x1x384xf32>
    %167 = vector.shape_cast %166 : vector<1x1x384xf32> to vector<1x384xf32>
    %c0_82 = arith.constant 0 : index
    %c0_83 = arith.constant 0 : index
    %c0_84 = arith.constant 0 : index
    %168 = vector.load %arg20[%c0_82, %c0_83, %c0_84] : memref<1x128x128xbf16, #tpu.memory_space<vmem>>, vector<1x128x128xbf16>
    %169 = vector.shape_cast %168 : vector<1x128x128xbf16> to vector<128x128xbf16>
    %c0_85 = arith.constant 0 : index
    %c0_86 = arith.constant 0 : index
    %c0_87 = arith.constant 0 : index
    %170 = vector.load %arg21[%c0_85, %c0_86, %c0_87] : memref<1x1x128xf32, #tpu.memory_space<vmem>>, vector<1x1x128xf32>
    %171 = vector.shape_cast %170 : vector<1x1x128xf32> to vector<1x128xf32>
    %cst_88 = arith.constant dense<0.000000e+00> : vector<16x384xf32>
    %172 = tpu.matmul %163, %165, %cst_88 {dimension_numbers = #tpu.dot_dimension_numbers<[1], [0], [0], [1], [0, 0, 1, 1], [], []>} : vector<16x128xbf16>, vector<128x384xbf16>, vector<16x384xf32> -> vector<16x384xf32>
    %173 = vector.broadcast %167 : vector<1x384xf32> to vector<16x384xf32>
    %174 = arith.addf %172, %173 : vector<16x384xf32>
    %175 = vector.extract_strided_slice %174 {offsets = [0, 0], sizes = [1, 128], strides = [1, 1]} : vector<16x384xf32> to vector<1x128xf32>
    %176 = vector.extract_strided_slice %174 {offsets = [0, 128], sizes = [16, 128], strides = [1, 1]} : vector<16x384xf32> to vector<16x128xf32>
    %177 = vector.extract_strided_slice %174 {offsets = [0, 256], sizes = [16, 128], strides = [1, 1]} : vector<16x384xf32> to vector<16x128xf32>
    %178 = vector.extract_strided_slice %175 {offsets = [0, 0], sizes = [1, 64], strides = [1, 1]} : vector<1x128xf32> to vector<1x64xf32>
    %179 = arith.truncf %178 : vector<1x64xf32> to vector<1x64xbf16>
    %180 = vector.extract_strided_slice %176 {offsets = [0, 0], sizes = [16, 64], strides = [1, 1]} : vector<16x128xf32> to vector<16x64xf32>
    %181 = arith.truncf %180 : vector<16x64xf32> to vector<16x64xbf16>
    %182 = vector.extract_strided_slice %177 {offsets = [0, 0], sizes = [16, 64], strides = [1, 1]} : vector<16x128xf32> to vector<16x64xf32>
    %183 = arith.truncf %182 : vector<16x64xf32> to vector<16x64xbf16>
    %184 = tpu.transpose %181, [1, 0] : vector<16x64xbf16> -> vector<64x16xbf16>
    %cst_89 = arith.constant dense<0.000000e+00> : vector<1x16xf32>
    %185 = tpu.matmul %179, %184, %cst_89 {dimension_numbers = #tpu.dot_dimension_numbers<[1], [0], [0], [1], [0, 0, 1, 1], [], []>} : vector<1x64xbf16>, vector<64x16xbf16>, vector<1x16xf32> -> vector<1x16xf32>
    %186 = arith.addf %185, %3 : vector<1x16xf32>
    %cst_90 = arith.constant dense<0xFF800000> : vector<1xf32>
    %187 = vector.multi_reduction <maximumf>, %186, %cst_90 [1] : vector<1x16xf32> to vector<1xf32>
    %188 = vector.shape_cast %187 : vector<1xf32> to vector<1x1xf32>
    %189 = vector.broadcast %188 : vector<1x1xf32> to vector<1x16xf32>
    %190 = arith.subf %186, %189 : vector<1x16xf32>
    %191 = math.exp %190 : vector<1x16xf32>
    %cst_91 = arith.constant dense<0.000000e+00> : vector<1xf32>
    %192 = vector.multi_reduction <add>, %191, %cst_91 [1] : vector<1x16xf32> to vector<1xf32>
    %193 = vector.shape_cast %192 : vector<1xf32> to vector<1x1xf32>
    %194 = tpu.reciprocal %193 {approx = true} : vector<1x1xf32> -> vector<1x1xf32>
    %195 = vector.broadcast %194 : vector<1x1xf32> to vector<1x16xf32>
    %196 = arith.mulf %191, %195 : vector<1x16xf32>
    %197 = arith.truncf %196 : vector<1x16xf32> to vector<1x16xbf16>
    %cst_92 = arith.constant dense<0.000000e+00> : vector<1x64xf32>
    %198 = tpu.matmul %197, %183, %cst_92 {dimension_numbers = #tpu.dot_dimension_numbers<[1], [0], [0], [1], [0, 0, 1, 1], [], []>} : vector<1x16xbf16>, vector<16x64xbf16>, vector<1x64xf32> -> vector<1x64xf32>
    %199 = arith.truncf %198 : vector<1x64xf32> to vector<1x64xbf16>
    %200 = vector.extract_strided_slice %175 {offsets = [0, 64], sizes = [1, 64], strides = [1, 1]} : vector<1x128xf32> to vector<1x64xf32>
    %201 = arith.truncf %200 : vector<1x64xf32> to vector<1x64xbf16>
    %202 = vector.extract_strided_slice %176 {offsets = [0, 64], sizes = [16, 64], strides = [1, 1]} : vector<16x128xf32> to vector<16x64xf32>
    %203 = arith.truncf %202 : vector<16x64xf32> to vector<16x64xbf16>
    %204 = vector.extract_strided_slice %177 {offsets = [0, 64], sizes = [16, 64], strides = [1, 1]} : vector<16x128xf32> to vector<16x64xf32>
    %205 = arith.truncf %204 : vector<16x64xf32> to vector<16x64xbf16>
    %206 = tpu.transpose %203, [1, 0] : vector<16x64xbf16> -> vector<64x16xbf16>
    %cst_93 = arith.constant dense<0.000000e+00> : vector<1x16xf32>
    %207 = tpu.matmul %201, %206, %cst_93 {dimension_numbers = #tpu.dot_dimension_numbers<[1], [0], [0], [1], [0, 0, 1, 1], [], []>} : vector<1x64xbf16>, vector<64x16xbf16>, vector<1x16xf32> -> vector<1x16xf32>
    %208 = arith.addf %207, %3 : vector<1x16xf32>
    %cst_94 = arith.constant dense<0xFF800000> : vector<1xf32>
    %209 = vector.multi_reduction <maximumf>, %208, %cst_94 [1] : vector<1x16xf32> to vector<1xf32>
    %210 = vector.shape_cast %209 : vector<1xf32> to vector<1x1xf32>
    %211 = vector.broadcast %210 : vector<1x1xf32> to vector<1x16xf32>
    %212 = arith.subf %208, %211 : vector<1x16xf32>
    %213 = math.exp %212 : vector<1x16xf32>
    %cst_95 = arith.constant dense<0.000000e+00> : vector<1xf32>
    %214 = vector.multi_reduction <add>, %213, %cst_95 [1] : vector<1x16xf32> to vector<1xf32>
    %215 = vector.shape_cast %214 : vector<1xf32> to vector<1x1xf32>
    %216 = tpu.reciprocal %215 {approx = true} : vector<1x1xf32> -> vector<1x1xf32>
    %217 = vector.broadcast %216 : vector<1x1xf32> to vector<1x16xf32>
    %218 = arith.mulf %213, %217 : vector<1x16xf32>
    %219 = arith.truncf %218 : vector<1x16xf32> to vector<1x16xbf16>
    %cst_96 = arith.constant dense<0.000000e+00> : vector<1x64xf32>
    %220 = tpu.matmul %219, %205, %cst_96 {dimension_numbers = #tpu.dot_dimension_numbers<[1], [0], [0], [1], [0, 0, 1, 1], [], []>} : vector<1x16xbf16>, vector<16x64xbf16>, vector<1x64xf32> -> vector<1x64xf32>
    %221 = arith.truncf %220 : vector<1x64xf32> to vector<1x64xbf16>
    %222 = tpu.concatenate %199, %221 in 1 : vector<1x64xbf16>, vector<1x64xbf16> -> vector<1x128xbf16>
    %cst_97 = arith.constant dense<0.000000e+00> : vector<1x128xf32>
    %223 = tpu.matmul %222, %169, %cst_97 {dimension_numbers = #tpu.dot_dimension_numbers<[1], [0], [0], [1], [0, 0, 1, 1], [], []>} : vector<1x128xbf16>, vector<128x128xbf16>, vector<1x128xf32> -> vector<1x128xf32>
    %224 = arith.addf %223, %171 : vector<1x128xf32>
    %225 = arith.truncf %224 : vector<1x128xf32> to vector<1x128xbf16>
    %c0_98 = arith.constant 0 : index
    %c0_99 = arith.constant 0 : index
    %c0_100 = arith.constant 0 : index
    %226 = vector.load %arg22[%c0_98, %c0_99, %c0_100] : memref<1x128x128xbf16, #tpu.memory_space<vmem>>, vector<1x128x128xbf16>
    %227 = vector.shape_cast %226 : vector<1x128x128xbf16> to vector<128x128xbf16>
    %cst_101 = arith.constant dense<0.000000e+00> : vector<1x128xf32>
    %228 = tpu.matmul %225, %227, %cst_101 {dimension_numbers = #tpu.dot_dimension_numbers<[1], [0], [0], [1], [0, 0, 1, 1], [], []>} : vector<1x128xbf16>, vector<128x128xbf16>, vector<1x128xf32> -> vector<1x128xf32>
    %c0_102 = arith.constant 0 : index
    %c0_103 = arith.constant 0 : index
    %c0_104 = arith.constant 0 : index
    %229 = vector.load %arg23[%c0_102, %c0_103, %c0_104] : memref<1x1x128xf32, #tpu.memory_space<vmem>>, vector<1x1x128xf32>
    %230 = vector.shape_cast %229 : vector<1x1x128xf32> to vector<1x128xf32>
    %231 = arith.addf %228, %230 : vector<1x128xf32>
    %232 = math.tanh %231 : vector<1x128xf32>
    %233 = arith.truncf %232 : vector<1x128xf32> to vector<1x128xbf16>
    %c0_105 = arith.constant 0 : index
    %c0_106 = arith.constant 0 : index
    %c0_107 = arith.constant 0 : index
    %234 = vector.load %arg24[%c0_105, %c0_106, %c0_107] : memref<1x128x4xbf16, #tpu.memory_space<vmem>>, vector<1x128x4xbf16>
    %235 = vector.shape_cast %234 : vector<1x128x4xbf16> to vector<128x4xbf16>
    %cst_108 = arith.constant dense<0.000000e+00> : vector<1x4xf32>
    %236 = tpu.matmul %233, %235, %cst_108 {dimension_numbers = #tpu.dot_dimension_numbers<[1], [0], [0], [1], [0, 0, 1, 1], [], []>} : vector<1x128xbf16>, vector<128x4xbf16>, vector<1x4xf32> -> vector<1x4xf32>
    %c0_109 = arith.constant 0 : index
    %c0_110 = arith.constant 0 : index
    %c0_111 = arith.constant 0 : index
    %237 = vector.load %arg25[%c0_109, %c0_110, %c0_111] : memref<1x1x4xf32, #tpu.memory_space<vmem>>, vector<1x1x4xf32>
    %238 = vector.shape_cast %237 : vector<1x1x4xf32> to vector<1x4xf32>
    %239 = arith.addf %236, %238 : vector<1x4xf32>
    %cst_112 = arith.constant dense<0xFF800000> : vector<1xf32>
    %240 = vector.multi_reduction <maximumf>, %239, %cst_112 [1] : vector<1x4xf32> to vector<1xf32>
    %241 = vector.shape_cast %240 : vector<1xf32> to vector<1x1xf32>
    %242 = vector.broadcast %241 : vector<1x1xf32> to vector<1x4xf32>
    %243 = arith.subf %239, %242 : vector<1x4xf32>
    %244 = math.exp %243 : vector<1x4xf32>
    %cst_113 = arith.constant dense<0.000000e+00> : vector<1xf32>
    %245 = vector.multi_reduction <add>, %244, %cst_113 [1] : vector<1x4xf32> to vector<1xf32>
    %246 = vector.shape_cast %245 : vector<1xf32> to vector<1x1xf32>
    %247 = vector.broadcast %246 : vector<1x1xf32> to vector<1x4xf32>
    %248 = arith.divf %244, %247 : vector<1x4xf32>
    %c0_114 = arith.constant 0 : index
    %c0_115 = arith.constant 0 : index
    %249 = vector.load %arg27[%c0_114, %c0_115] : memref<1x4xf32, #tpu.memory_space<vmem>>, vector<1x4xf32>
    tpu.vector_store %arg27[%c0_114, %c0_115], %248 {strides = array<i32>} : memref<1x4xf32, #tpu.memory_space<vmem>>, vector<1x4xf32>,
    return
  }
  func.func @transform_0(%arg0: i32, %arg1: memref<1xi32, #tpu.memory_space<smem>>) -> (i32, i32, i32) {
    %c0_i32 = arith.constant 0 : i32
    %c0_i32_0 = arith.constant 0 : i32
    %c0_i32_1 = arith.constant 0 : i32
    return %arg0, %c0_i32, %c0_i32_0 : i32, i32, i32
  }
  func.func @transform_1(%arg0: i32, %arg1: memref<1xi32, #tpu.memory_space<smem>>) -> (i32, i32, i32) {
    %c0_i32 = arith.constant 0 : i32
    %c0_i32_0 = arith.constant 0 : i32
    %c0_i32_1 = arith.constant 0 : i32
    return %arg0, %c0_i32, %c0_i32_0 : i32, i32, i32
  }
  func.func @transform_2(%arg0: i32, %arg1: memref<1xi32, #tpu.memory_space<smem>>) -> (i32, i32, i32) {
    %c0 = arith.constant 0 : index
    %0 = memref.load %arg1[%c0] : memref<1xi32, #tpu.memory_space<smem>>
    %c0_i32 = arith.constant 0 : i32
    %c0_i32_0 = arith.constant 0 : i32
    %c0_i32_1 = arith.constant 0 : i32
    return %0, %c0_i32, %c0_i32_0 : i32, i32, i32
  }
  func.func @transform_3(%arg0: i32, %arg1: memref<1xi32, #tpu.memory_space<smem>>) -> (i32, i32, i32) {
    %c0 = arith.constant 0 : index
    %0 = memref.load %arg1[%c0] : memref<1xi32, #tpu.memory_space<smem>>
    %c0_i32 = arith.constant 0 : i32
    %c0_i32_0 = arith.constant 0 : i32
    %c0_i32_1 = arith.constant 0 : i32
    return %0, %c0_i32, %c0_i32_0 : i32, i32, i32
  }
  func.func @transform_4(%arg0: i32, %arg1: memref<1xi32, #tpu.memory_space<smem>>) -> (i32, i32, i32) {
    %c0 = arith.constant 0 : index
    %0 = memref.load %arg1[%c0] : memref<1xi32, #tpu.memory_space<smem>>
    %c0_i32 = arith.constant 0 : i32
    %c0_i32_0 = arith.constant 0 : i32
    %c0_i32_1 = arith.constant 0 : i32
    return %0, %c0_i32, %c0_i32_0 : i32, i32, i32
  }
  func.func @transform_5(%arg0: i32, %arg1: memref<1xi32, #tpu.memory_space<smem>>) -> (i32, i32, i32) {
    %c0 = arith.constant 0 : index
    %0 = memref.load %arg1[%c0] : memref<1xi32, #tpu.memory_space<smem>>
    %c0_i32 = arith.constant 0 : i32
    %c0_i32_0 = arith.constant 0 : i32
    %c0_i32_1 = arith.constant 0 : i32
    return %0, %c0_i32, %c0_i32_0 : i32, i32, i32
  }
  func.func @transform_6(%arg0: i32, %arg1: memref<1xi32, #tpu.memory_space<smem>>) -> (i32, i32, i32) {
    %c0 = arith.constant 0 : index
    %0 = memref.load %arg1[%c0] : memref<1xi32, #tpu.memory_space<smem>>
    %c0_i32 = arith.constant 0 : i32
    %c0_i32_0 = arith.constant 0 : i32
    %c0_i32_1 = arith.constant 0 : i32
    return %0, %c0_i32, %c0_i32_0 : i32, i32, i32
  }
  func.func @transform_7(%arg0: i32, %arg1: memref<1xi32, #tpu.memory_space<smem>>) -> (i32, i32, i32) {
    %c0 = arith.constant 0 : index
    %0 = memref.load %arg1[%c0] : memref<1xi32, #tpu.memory_space<smem>>
    %c0_i32 = arith.constant 0 : i32
    %c0_i32_0 = arith.constant 0 : i32
    %c0_i32_1 = arith.constant 0 : i32
    return %0, %c0_i32, %c0_i32_0 : i32, i32, i32
  }
  func.func @transform_8(%arg0: i32, %arg1: memref<1xi32, #tpu.memory_space<smem>>) -> (i32, i32, i32) {
    %c0 = arith.constant 0 : index
    %0 = memref.load %arg1[%c0] : memref<1xi32, #tpu.memory_space<smem>>
    %c0_i32 = arith.constant 0 : i32
    %c0_i32_0 = arith.constant 0 : i32
    %c0_i32_1 = arith.constant 0 : i32
    return %0, %c0_i32, %c0_i32_0 : i32, i32, i32
  }
  func.func @transform_9(%arg0: i32, %arg1: memref<1xi32, #tpu.memory_space<smem>>) -> (i32, i32, i32) {
    %c0 = arith.constant 0 : index
    %0 = memref.load %arg1[%c0] : memref<1xi32, #tpu.memory_space<smem>>
    %c0_i32 = arith.constant 0 : i32
    %c0_i32_0 = arith.constant 0 : i32
    %c0_i32_1 = arith.constant 0 : i32
    return %0, %c0_i32, %c0_i32_0 : i32, i32, i32
  }
  func.func @transform_10(%arg0: i32, %arg1: memref<1xi32, #tpu.memory_space<smem>>) -> (i32, i32, i32) {
    %c0 = arith.constant 0 : index
    %0 = memref.load %arg1[%c0] : memref<1xi32, #tpu.memory_space<smem>>
    %c0_i32 = arith.constant 0 : i32
    %c0_i32_0 = arith.constant 0 : i32
    %c0_i32_1 = arith.constant 0 : i32
    return %0, %c0_i32, %c0_i32_0 : i32, i32, i32
  }
  func.func @transform_11(%arg0: i32, %arg1: memref<1xi32, #tpu.memory_space<smem>>) -> (i32, i32, i32) {
    %c0 = arith.constant 0 : index
    %0 = memref.load %arg1[%c0] : memref<1xi32, #tpu.memory_space<smem>>
    %c0_i32 = arith.constant 0 : i32
    %c0_i32_0 = arith.constant 0 : i32
    %c0_i32_1 = arith.constant 0 : i32
    return %0, %c0_i32, %c0_i32_0 : i32, i32, i32
  }
  func.func @transform_12(%arg0: i32, %arg1: memref<1xi32, #tpu.memory_space<smem>>) -> (i32, i32, i32) {
    %c0 = arith.constant 0 : index
    %0 = memref.load %arg1[%c0] : memref<1xi32, #tpu.memory_space<smem>>
    %c0_i32 = arith.constant 0 : i32
    %c0_i32_0 = arith.constant 0 : i32
    %c0_i32_1 = arith.constant 0 : i32
    return %0, %c0_i32, %c0_i32_0 : i32, i32, i32
  }
  func.func @transform_13(%arg0: i32, %arg1: memref<1xi32, #tpu.memory_space<smem>>) -> (i32, i32, i32) {
    %c0 = arith.constant 0 : index
    %0 = memref.load %arg1[%c0] : memref<1xi32, #tpu.memory_space<smem>>
    %c0_i32 = arith.constant 0 : i32
    %c0_i32_0 = arith.constant 0 : i32
    %c0_i32_1 = arith.constant 0 : i32
    return %0, %c0_i32, %c0_i32_0 : i32, i32, i32
  }
  func.func @transform_14(%arg0: i32, %arg1: memref<1xi32, #tpu.memory_space<smem>>) -> (i32, i32, i32) {
    %c0 = arith.constant 0 : index
    %0 = memref.load %arg1[%c0] : memref<1xi32, #tpu.memory_space<smem>>
    %c0_i32 = arith.constant 0 : i32
    %c0_i32_0 = arith.constant 0 : i32
    %c0_i32_1 = arith.constant 0 : i32
    return %0, %c0_i32, %c0_i32_0 : i32, i32, i32
  }
  func.func @transform_15(%arg0: i32, %arg1: memref<1xi32, #tpu.memory_space<smem>>) -> (i32, i32, i32) {
    %c0 = arith.constant 0 : index
    %0 = memref.load %arg1[%c0] : memref<1xi32, #tpu.memory_space<smem>>
    %c0_i32 = arith.constant 0 : i32
    %c0_i32_0 = arith.constant 0 : i32
    %c0_i32_1 = arith.constant 0 : i32
    return %0, %c0_i32, %c0_i32_0 : i32, i32, i32
  }
  func.func @transform_16(%arg0: i32, %arg1: memref<1xi32, #tpu.memory_space<smem>>) -> (i32, i32, i32) {
    %c0 = arith.constant 0 : index
    %0 = memref.load %arg1[%c0] : memref<1xi32, #tpu.memory_space<smem>>
    %c0_i32 = arith.constant 0 : i32
    %c0_i32_0 = arith.constant 0 : i32
    %c0_i32_1 = arith.constant 0 : i32
    return %0, %c0_i32, %c0_i32_0 : i32, i32, i32
  }
  func.func @transform_17(%arg0: i32, %arg1: memref<1xi32, #tpu.memory_space<smem>>) -> (i32, i32, i32) {
    %c0 = arith.constant 0 : index
    %0 = memref.load %arg1[%c0] : memref<1xi32, #tpu.memory_space<smem>>
    %c0_i32 = arith.constant 0 : i32
    %c0_i32_0 = arith.constant 0 : i32
    %c0_i32_1 = arith.constant 0 : i32
    return %0, %c0_i32, %c0_i32_0 : i32, i32, i32
  }
  func.func @transform_18(%arg0: i32, %arg1: memref<1xi32, #tpu.memory_space<smem>>) -> (i32, i32, i32) {
    %c0 = arith.constant 0 : index
    %0 = memref.load %arg1[%c0] : memref<1xi32, #tpu.memory_space<smem>>
    %c0_i32 = arith.constant 0 : i32
    %c0_i32_0 = arith.constant 0 : i32
    %c0_i32_1 = arith.constant 0 : i32
    return %0, %c0_i32, %c0_i32_0 : i32, i32, i32
  }
  func.func @transform_19(%arg0: i32, %arg1: memref<1xi32, #tpu.memory_space<smem>>) -> (i32, i32, i32) {
    %c0 = arith.constant 0 : index
    %0 = memref.load %arg1[%c0] : memref<1xi32, #tpu.memory_space<smem>>
    %c0_i32 = arith.constant 0 : i32
    %c0_i32_0 = arith.constant 0 : i32
    %c0_i32_1 = arith.constant 0 : i32
    return %0, %c0_i32, %c0_i32_0 : i32, i32, i32
  }
  func.func @transform_20(%arg0: i32, %arg1: memref<1xi32, #tpu.memory_space<smem>>) -> (i32, i32, i32) {
    %c0 = arith.constant 0 : index
    %0 = memref.load %arg1[%c0] : memref<1xi32, #tpu.memory_space<smem>>
    %c0_i32 = arith.constant 0 : i32
    %c0_i32_0 = arith.constant 0 : i32
    %c0_i32_1 = arith.constant 0 : i32
    return %0, %c0_i32, %c0_i32_0 : i32, i32, i32
  }
  func.func @transform_21(%arg0: i32, %arg1: memref<1xi32, #tpu.memory_space<smem>>) -> (i32, i32, i32) {
    %c0 = arith.constant 0 : index
    %0 = memref.load %arg1[%c0] : memref<1xi32, #tpu.memory_space<smem>>
    %c0_i32 = arith.constant 0 : i32
    %c0_i32_0 = arith.constant 0 : i32
    %c0_i32_1 = arith.constant 0 : i32
    return %0, %c0_i32, %c0_i32_0 : i32, i32, i32
  }
  func.func @transform_22(%arg0: i32, %arg1: memref<1xi32, #tpu.memory_space<smem>>) -> (i32, i32, i32) {
    %c0 = arith.constant 0 : index
    %0 = memref.load %arg1[%c0] : memref<1xi32, #tpu.memory_space<smem>>
    %c0_i32 = arith.constant 0 : i32
    %c0_i32_0 = arith.constant 0 : i32
    %c0_i32_1 = arith.constant 0 : i32
    return %0, %c0_i32, %c0_i32_0 : i32, i32, i32
  }
  func.func @transform_23(%arg0: i32, %arg1: memref<1xi32, #tpu.memory_space<smem>>) -> (i32, i32, i32) {
    %c0 = arith.constant 0 : index
    %0 = memref.load %arg1[%c0] : memref<1xi32, #tpu.memory_space<smem>>
    %c0_i32 = arith.constant 0 : i32
    %c0_i32_0 = arith.constant 0 : i32
    %c0_i32_1 = arith.constant 0 : i32
    return %0, %c0_i32, %c0_i32_0 : i32, i32, i32
  }
  func.func @transform_24(%arg0: i32, %arg1: memref<1xi32, #tpu.memory_space<smem>>) -> (i32, i32, i32) {
    %c0_i32 = arith.constant 0 : i32
    %c0_i32_0 = arith.constant 0 : i32
    %c0_i32_1 = arith.constant 0 : i32
    return %arg0, %c0_i32, %c0_i32_0 : i32, i32, i32
  }
  func.func @transform_25(%arg0: i32, %arg1: memref<1xi32, #tpu.memory_space<smem>>) -> (i32, i32) {
    %c0_i32 = arith.constant 0 : i32
    %c0_i32_0 = arith.constant 0 : i32
    return %arg0, %c0_i32 : i32, i32
  }
}

</mosaic_0001>

<bundles_post_ra>
// kernel: tpu_custom_call.1
= control target key start
LH: loop header
LB: loop body
LE: loop exit
PB: predicated region body
PF: predicated region fallthrough
CT: control target
= control target key end

     0   :  { %9 = vsyncpa [#allocation5], 0  ;;  %s177_s0 = inlined_call_operand.<no memory space> [shape: s32[1], index: 0, kind: input, shape index: {}]   ;;  %s178_s1 = inlined_call_operand.hbm [shape: f32[1,8,128], index: 1, kind: input, shape index: {}]   ;;  %s179_s2 = inlined_call_operand.hbm [shape: f32[2,8,128], index: 2, kind: input, shape index: {}]   ;;  %s180_s3 = inlined_call_operand.hbm [shape: f32[1,8,128], index: 3, kind: output, shape index: {}]  }
   0x1   :  { %10 = vsyncpa [#allocation8], 0 }
   0x2   :  { %11 = vsyncpa [#allocation6], 0  ;;  %s64_s14 = sshll.u32 %s177_s0, 7  ;;  %s136_s15 = smov [#allocation4]  }
   0x3   :  { %s18_s16 = sshll.u32 %s136_s15, 4  ;;  %s29_s19 = scalar_lea.hbm %s179_s2, %s64_s14  ;;  %s19_s16 = int_to_ptr.vmem [resolvable:$true] %s18_s16 }
   0x4   :  { %s76_s20 = scalar_lea.vmem %s19_s16, 128  ;;  %p81_p1 = scmp.lt.s32.totalorder %s19_s16, %s19_s16 }
   0x5   :  { %p77_p0 = scmp.ne.s32.totalorder %s19_s16, %s76_s20  ;;  %p82_p2 = scmp.lt.s32.totalorder %s76_s20, %s76_s20 }
   0x7   :  { %p83_p3 = por %p82_p2, %p81_p1 }
   0x9   :  { %p84_p4 = pnand %p83_p3, %p77_p0 }
   0xb   :  { %87 = shalt.err (!%p84_p4)
}
   0xc   :  { %21 = dma.hbm_to_vmem [thread:$0]  %s178_s1, 128, %s19_s16, [#allocation5]  }
   0xd   :  { %s137_s23 = smov [#allocation7]   ;;  %s88_s24 = scalar_lea.hbm %s29_s19, 128 }
   0xe   :  { %s31_s0 = sshll.u32 %s137_s23, 4  ;;  %p89_p5 = scmp.ne.s32.totalorder %s29_s19, %s88_s24  ;;  %s32_s0 = int_to_ptr.vmem [resolvable:$true] %s31_s0 }
   0xf   :  { %s90_s27 = scalar_lea.hbm %s179_s2, 256  ;;  %p91_p6 = scmp.lt.s32.totalorder %s29_s19, %s179_s2 }
  0x10   :  { %p92_p7 = scmp.lt.s32.totalorder %s90_s27, %s88_s24 }
  0x12   :  { %p93_p8 = por %p92_p7, %p91_p6 }
  0x14   :  { %p94_p9 = pnand %p93_p8, %p89_p5 }
  0x16   :  { %97 = shalt.err (!%p94_p9)
}
  0x17   :  { %s98_s30 = scalar_lea.vmem %s32_s0, 128  ;;  %p103_p11 = scmp.lt.s32.totalorder %s32_s0, %s32_s0 }
  0x18   :  { %p99_p10 = scmp.ne.s32.totalorder %s32_s0, %s98_s30  ;;  %p104_p12 = scmp.lt.s32.totalorder %s98_s30, %s98_s30 }
  0x1a   :  { %p105_p13 = por %p104_p12, %p103_p11 }
  0x1c   :  { %p106_p0 = pnand %p105_p13, %p99_p10 }
  0x1e   :  { %109 = shalt.err (!%p106_p0)
}
  0x1f   :  { %34 = dma.hbm_to_vmem [thread:$0]  %s29_s19, 128, %s32_s0, [#allocation8]  }
  0x20   :  { %130 = dma.done.wait [#allocation5], 128  }
  0x21   :  { %131 = vsyncadd [#allocation5], 4294967168 }
  0x22   :  { %132 = dma.done.wait [#allocation8], 128  }
  0x23   :  { %133 = vsyncadd [#allocation8], 4294967168  ;;  %s138_s1 = smov [#allocation9]   ;;  %v42_v0 = vld [vmem:[#allocation4] sm:$0xff]  ;;  %v43_v1 = vld [vmem:[#allocation7] sm:$0xff] }
  0x24   :  { %s52_s4 = sshll.u32 %s138_s1, 4  ;;  %v44_v2 = vadd.f32 %v43_v1, %v42_v0  ;;  %s53_s4 = int_to_ptr.vmem [resolvable:$true] %s52_s4 }
  0x25   :  { %s110_s2 = scalar_lea.vmem %s53_s4, 128  ;;  %p115_p2 = scmp.lt.s32.totalorder %s53_s4, %s53_s4 }
  0x26   :  { %45 = vst [vmem:[#allocation9] sm:$0xff] %v44_v2  ;;  %p111_p1 = scmp.ne.s32.totalorder %s53_s4, %s110_s2  ;;  %p116_p3 = scmp.lt.s32.totalorder %s110_s2, %s110_s2 }
  0x28   :  { %p117_p4 = por %p116_p3, %p115_p2 }
  0x2a   :  { %p118_p5 = pnand %p117_p4, %p111_p1 }
  0x2c   :  { %121 = shalt.err (!%p118_p5)
}
  0x2d   :  { %55 = dma.vmem_to_hbm [thread:$0]  %s53_s4, 128, %s180_s3, [#allocation6]  }
  0x2e   :  { %134 = dma.done.wait [#allocation6], 128  }
  0x2f   :  { %135 = vsyncadd [#allocation6], 4294967168 }
  0x30   :  { %59 = vsyncpa [#allocation5], 1 }
  0x31   :  { %60 = vsyncpa [#allocation8], 1 }
  0x32   :  { %61 = vsyncpa [#allocation6], 1 }

// kernel: tpu_custom_call.1
= control target key start
LH: loop header
LB: loop body
LE: loop exit
PB: predicated region body
PF: predicated region fallthrough
CT: control target
= control target key end

     0   :  { %9 = vsyncpa [#allocation5], 0  ;;  %s152_s0 = inlined_call_operand.<no memory space> [shape: s32[1], index: 0, kind: input, shape index: {}]   ;;  %s153_s1 = inlined_call_operand.hbm [shape: f32[1,8,128], index: 1, kind: input, shape index: {}, may-alias: {1,3}]   ;;  %s154_s2 = inlined_call_operand.vmem [shape: f32[2,8,128], index: 2, kind: input, shape index: {}]   ;;  %s155_s3 = inlined_call_operand.hbm [shape: f32[1,8,128], index: 3, kind: output, shape index: {}, may-alias: {1,3}]  }
   0x1   :  { %10 = vsyncpa [#allocation6], 0  ;;  %s115_s12 = smov [#allocation4]  }
   0x2   :  { %s17_s13 = sshll.u32 %s115_s12, 4  ;;  %s18_s13 = int_to_ptr.vmem [resolvable:$true] %s17_s13 }
   0x3   :  { %s79_s14 = scalar_lea.vmem %s18_s13, 128  ;;  %p84_p1 = scmp.lt.s32.totalorder %s18_s13, %s18_s13 }
   0x4   :  { %p80_p0 = scmp.ne.s32.totalorder %s18_s13, %s79_s14  ;;  %p85_p2 = scmp.lt.s32.totalorder %s79_s14, %s79_s14 }
   0x6   :  { %p86_p3 = por %p85_p2, %p84_p1 }
   0x8   :  { %p87_p4 = pnand %p86_p3, %p80_p0 }
   0xa   :  { %90 = shalt.err (!%p87_p4)
}
   0xb   :  { %20 = dma.hbm_to_vmem [thread:$0]  %s153_s1, 128, %s18_s13, [#allocation5]  }
   0xc   :  { %111 = dma.done.wait [#allocation5], 128  }
   0xd   :  { %112 = vsyncadd [#allocation5], 4294967168  ;;  %p38_p5 = scmp.lt.s32.totalorder %s152_s0, 1  ;;  %s116_s25 = smov [#allocation7]   ;;  %v43_v0 = vld [vmem:[#allocation4] sm:$0xff] }
   0xe   :  { %s53_s26 = sshll.u32 %s116_s25, 4  ;;  %s54_s26 = int_to_ptr.vmem [resolvable:$true] %s53_s26 }
   0xf   :  { %s157_s0 = smov (!%p38_p5, %s152_s0), 1  ;;  %s91_s1 = scalar_lea.vmem %s54_s26, 128 }
  0x10   :  { %s68_s21 = sshll.u32 %s157_s0, 3  ;;  %p92_p6 = scmp.ne.s32.totalorder %s54_s26, %s91_s1 }
  0x11   :  { %s41_s24 = scalar_lea.vmem %s154_s2, %s68_s21  ;;  %p96_p7 = scmp.lt.s32.totalorder %s54_s26, %s54_s26 }
  0x12   :  { %v44_v1 = vld [vmem:[%s41_s24] sm:$0xff]  ;;  %p97_p8 = scmp.lt.s32.totalorder %s91_s1, %s91_s1 }
  0x13   :  { %v45_v2 = vadd.f32 %v44_v1, %v43_v0 }
  0x14   :  { %p98_p9 = por %p97_p8, %p96_p7 }
  0x15   :  { %46 = vst [vmem:[#allocation7] sm:$0xff] %v45_v2 }
  0x16   :  { %p99_p10 = pnand %p98_p9, %p92_p6 }
  0x18   :  { %102 = shalt.err (!%p99_p10)
}
  0x19   :  { %56 = dma.vmem_to_hbm [thread:$0]  %s54_s26, 128, %s155_s3, [#allocation6]  }
  0x1a   :  { %113 = dma.done.wait [#allocation6], 128  }
  0x1b   :  { %114 = vsyncadd [#allocation6], 4294967168 }
  0x1c   :  { %60 = vsyncpa [#allocation5], 1 }
  0x1d   :  { %61 = vsyncpa [#allocation6], 1 }

// kernel: body.3
= control target key start
LH: loop header
LB: loop body
LE: loop exit
PB: predicated region body
PF: predicated region fallthrough
CT: control target
= control target key end

     0   :  { %s4032_s0 = inlined_call_operand.<no memory space> [shape: s32[1], index: 0, kind: input, shape index: {}]   ;;  %s4033_s1 = inlined_call_operand.vmem [shape: bf16[1,16,128], index: 1, kind: input, shape index: {}]   ;;  %s4034_s2 = inlined_call_operand.vmem [shape: f32[1,1,16], index: 2, kind: input, shape index: {}]   ;;  %s4035_s3 = inlined_call_operand.vmem [shape: bf16[3,128,384], index: 3, kind: input, shape index: {}]   ;;  %s4036_s4 = inlined_call_operand.vmem [shape: f32[3,1,384], index: 4, kind: input, shape index: {}]   ;;  %s4037_s5 = inlined_call_operand.hbm [shape: bf16[3,128,128], index: 5, kind: input, shape index: {}]   ;;  %s4038_s6 = inlined_call_operand.vmem [shape: f32[3,1,128], index: 6, kind: input, shape index: {}]   ;;  %s4039_s7 = inlined_call_operand.vmem [shape: f32[3,1,128], index: 7, kind: input, shape index: {}]   ;;  %s4040_s8 = inlined_call_operand.vmem [shape: f32[3,1,128], index: 8, kind: input, shape index: {}]   ;;  %s4041_s9 = inlined_call_operand.hbm [shape: bf16[3,128,256], index: 9, kind: input, shape index: {}]   ;;  %s4042_s10 = inlined_call_operand.vmem [shape: f32[3,1,256], index: 10, kind: input, shape index: {}]   ;;  %s4043_s11 = inlined_call_operand.hbm [shape: bf16[3,256,128], index: 11, kind: input, shape index: {}]   ;;  %s4044_s12 = inlined_call_operand.vmem [shape: f32[3,1,128], index: 12, kind: input, shape index: {}]   ;;  %s4045_s13 = inlined_call_operand.vmem [shape: f32[3,1,128], index: 13, kind: input, shape index: {}]   ;;  %s4046_s14 = inlined_call_operand.vmem [shape: f32[3,1,128], index: 14, kind: input, shape index: {}]   ;;  %s4047_s15 = inlined_call_operand.hbm [shape: bf16[3,128,128], index: 15, kind: input, shape index: {}]   ;;  %s4048_s16 = inlined_call_operand.vmem [shape: f32[3,1,128], index: 16, kind: input, shape index: {}]   ;;  %s4049_s17 = inlined_call_operand.hbm [shape: bf16[3,128,384], index: 17, kind: input, shape index: {}]   ;;  %s4050_s18 = inlined_call_operand.vmem [shape: f32[3,1,384], index: 18, kind: input, shape index: {}]   ;;  %s4051_s19 = inlined_call_operand.hbm [shape: bf16[3,128,128], index: 19, kind: input, shape index: {}]   ;;  %s4052_s20 = inlined_call_operand.vmem [shape: f32[3,1,128], index: 20, kind: input, shape index: {}]   ;;  %s4053_s21 = inlined_call_operand.hbm [shape: bf16[3,128,128], index: 21, kind: input, shape index: {}]   ;;  %s4054_s22 = inlined_call_operand.vmem [shape: f32[3,1,128], index: 22, kind: input, shape index: {}]   ;;  %s4055_s23 = inlined_call_operand.vmem [shape: bf16[3,128,4], index: 23, kind: input, shape index: {}]   ;;  %s4056_s24 = inlined_call_operand.vmem [shape: f32[3,1,4], index: 24, kind: input, shape index: {}]   ;;  %s4057_s25 = inlined_call_operand.vmem [shape: bf16[1,16,128], index: 25, kind: output, shape index: {0}]   ;;  %s4058_s26 = inlined_call_operand.vmem [shape: f32[1,4], index: 26, kind: output, shape index: {1}]  }
   0x1   :  { %4063 = sst [smem:[#allocation19_spill]] %s4032_s0 }
   0x2   :  { %4064 = sst [smem:[#allocation20_spill]] %s4033_s1 }
   0x3   :  { %4065 = sst [smem:[#allocation21_spill]] %s4034_s2 }
   0x4   :  { %4066 = sst [smem:[#allocation22_spill]] %s4035_s3 }
   0x5   :  { %4067 = sst [smem:[#allocation23_spill]] %s4036_s4 }
   0x6   :  { %4068 = sst [smem:[#allocation24_spill]] %s4037_s5 }
   0x7   :  { %4069 = sst [smem:[#allocation25_spill]] %s4038_s6 }
   0x8   :  { %4070 = sst [smem:[#allocation26_spill]] %s4039_s7 }
   0x9   :  { %4071 = sst [smem:[#allocation27_spill]] %s4040_s8 }
   0xa   :  { %4072 = sst [smem:[#allocation28_spill]] %s4041_s9 }
   0xb   :  { %4073 = sst [smem:[#allocation29_spill]] %s4042_s10 }
   0xc   :  { %4074 = sst [smem:[#allocation30_spill]] %s4054_s22 }
   0xd   :  { %4075 = sst [smem:[#allocation31_spill]] %s4056_s24 }
   0xe   :  { %4076 = sst [smem:[#allocation32_spill]] %s4058_s26 }
   0xf   :  { %33 = vsyncpa [#allocation5], 0 }
  0x10   :  { %34 = vsyncpa [#allocation7], 0 }
  0x11   :  { %35 = vsyncpa [#allocation10], 0  ;;  %s4077_s7 = sld [smem:[#allocation19_spill]] }
  0x17   :  { %s2748_s28 = sshll.u32 %s4077_s7, 11 }
  0x18   :  { %36 = vsyncpa [#allocation13], 0  ;;  %s4078_s29 = sld [smem:[#allocation28_spill]]  ;;  %s3436_s9 = smov [#allocation6]  }
  0x19   :  { %s104_s30 = sshll.u32 %s3436_s9, 4  ;;  %s3596_s10 = scalar_lea.hbm %s4043_s11, %s2748_s28  ;;  %s105_s30 = int_to_ptr.vmem [resolvable:$true] %s104_s30 }
  0x1e   :  { %s103_s0 = scalar_lea.hbm %s4078_s29, %s2748_s28  ;;  %s3276_s27 = scalar_lea.hbm %s4078_s29, 6144 }
  0x1f   :  { %s3274_s6 = scalar_lea.hbm %s103_s0, 2048  ;;  %p3277_p1 = scmp.lt.s32.totalorder %s103_s0, %s4078_s29 }
  0x20   :  { %p3275_p0 = scmp.ne.s32.totalorder %s103_s0, %s3274_s6  ;;  %p3278_p2 = scmp.lt.s32.totalorder %s3276_s27, %s3274_s6 }
  0x22   :  { %p3279_p3 = por %p3278_p2, %p3277_p1 }
  0x24   :  { %p3280_p4 = pnand %p3279_p3, %p3275_p0 }
  0x26   :  { %3283 = shalt.err (!%p3280_p4)
}
  0x27   :  { %s3284_s8 = scalar_lea.vmem %s105_s30, 2048  ;;  %p3289_p6 = scmp.lt.s32.totalorder %s105_s30, %s105_s30 }
  0x28   :  { %p3285_p5 = scmp.ne.s32.totalorder %s105_s30, %s3284_s8  ;;  %p3290_p7 = scmp.lt.s32.totalorder %s3284_s8, %s3284_s8 }
  0x2a   :  { %p3291_p8 = por %p3290_p7, %p3289_p6 }
  0x2c   :  { %p3292_p9 = pnand %p3291_p8, %p3285_p5 }
  0x2e   :  { %3295 = shalt.err (!%p3292_p9)
}
  0x2f   :  { %s3437_s28 = smov 128   ;;  %s3438_s4 = smov 8  }
  0x30   :  { %110 = dma.hbm_to_vmem [thread:$0]  %s103_s0, 2048, %s105_s30, [#allocation7], %s3437_s28, %s3437_s28, %s3438_s4  }
  0x31   :  { %s3607_s2 = sshll.u32 %s4077_s7, 10  ;;  %s3439_s3 = smov [#allocation9]  }
  0x32   :  { %s164_s5 = scalar_lea.hbm %s4047_s15, %s3607_s2  ;;  %s3617_s27 = scalar_lea.hbm %s4051_s19, %s3607_s2 }
  0x33   :  { %s165_s8 = sshll.u32 %s3439_s3, 4  ;;  %s3440_s0 = smov [#allocation12]   ;;  %s166_s8 = int_to_ptr.vmem [resolvable:$true] %s165_s8 }
  0x34   :  { %s212_s30 = sshll.u32 %s3440_s0, 4  ;;  %s3296_s28 = scalar_lea.hbm %s164_s5, 1024  ;;  %s213_s30 = int_to_ptr.vmem [resolvable:$true] %s212_s30 }
  0x35   :  { %p3297_p10 = scmp.ne.s32.totalorder %s164_s5, %s3296_s28  ;;  %s3298_s9 = scalar_lea.hbm %s4047_s15, 3072 }
  0x36   :  { %p3299_p11 = scmp.lt.s32.totalorder %s164_s5, %s4047_s15  ;;  %p3300_p12 = scmp.lt.s32.totalorder %s3298_s9, %s3296_s28 }
  0x38   :  { %p3301_p13 = por %p3300_p12, %p3299_p11 }
  0x3a   :  { %p3302_p0 = pnand %p3301_p13, %p3297_p10 }
  0x3c   :  { %3305 = shalt.err (!%p3302_p0)
}
  0x3d   :  { %s3306_s29 = scalar_lea.vmem %s166_s8, 1024  ;;  %p3311_p2 = scmp.lt.s32.totalorder %s166_s8, %s166_s8 }
  0x3e   :  { %p3307_p1 = scmp.ne.s32.totalorder %s166_s8, %s3306_s29  ;;  %p3312_p3 = scmp.lt.s32.totalorder %s3306_s29, %s3306_s29 }
  0x40   :  { %p3313_p4 = por %p3312_p3, %p3311_p2 }
  0x42   :  { %p3314_p5 = pnand %p3313_p4, %p3307_p1 }
  0x44   :  { %3317 = shalt.err (!%p3314_p5)
}
  0x45   :  { %s3441_s6 = smov 64   ;;  %s3442_s1 = smov 4  }
  0x46   :  { %171 = dma.hbm_to_vmem [thread:$0]  %s164_s5, 1024, %s166_s8, [#allocation10], %s3441_s6, %s3441_s6, %s3442_s1  }
  0x47   :  { %s4079_s3 = sld [smem:[#allocation24_spill]]  ;;  %s3318_s28 = scalar_lea.hbm %s3617_s27, 1024 }
  0x48   :  { %p3319_p6 = scmp.ne.s32.totalorder %s3617_s27, %s3318_s28  ;;  %s3320_s9 = scalar_lea.hbm %s4051_s19, 3072 }
  0x49   :  { %p3321_p7 = scmp.lt.s32.totalorder %s3617_s27, %s4051_s19  ;;  %p3322_p8 = scmp.lt.s32.totalorder %s3320_s9, %s3318_s28 }
  0x4b   :  { %p3323_p9 = por %p3322_p8, %p3321_p7 }
  0x4d   :  { %s3632_s0 = scalar_lea.hbm %s4079_s3, %s3607_s2  ;;  %p3324_p10 = pnand %p3323_p9, %p3319_p6 }
  0x4f   :  { %3327 = shalt.err (!%p3324_p10)
}
  0x50   :  { %s3328_s5 = scalar_lea.vmem %s213_s30, 1024  ;;  %p3333_p12 = scmp.lt.s32.totalorder %s213_s30, %s213_s30 }
  0x51   :  { %p3329_p11 = scmp.ne.s32.totalorder %s213_s30, %s3328_s5  ;;  %p3334_p13 = scmp.lt.s32.totalorder %s3328_s5, %s3328_s5 }
  0x53   :  { %p3335_p0 = por %p3334_p13, %p3333_p12 }
  0x55   :  { %p3336_p1 = pnand %p3335_p0, %p3329_p11 }
  0x57   :  { %3339 = shalt.err (!%p3336_p1)
}
  0x58   :  { %218 = dma.hbm_to_vmem [thread:$0]  %s3617_s27, 1024, %s213_s30, [#allocation13], %s3441_s6, %s3441_s6, %s3442_s1  }
  0x59   :  { %s3443_s19 = smov [#allocation4]   ;;  %s3444_s15 = smov [#allocation8]  }
  0x5a   :  { %s67_s8 = sshll.u32 %s3443_s19, 4  ;;  %s128_s22 = sshll.u32 %s3444_s15, 4  ;;  %s68_s8 = int_to_ptr.vmem [resolvable:$true] %s67_s8  ;;  %s3647_s22 = int_to_ptr.vmem [resolvable:$true] %s128_s22 }
  0x5b   :  { %s3340_s28 = scalar_lea.hbm %s3632_s0, 1024  ;;  %s3342_s9 = scalar_lea.hbm %s4079_s3, 3072 }
  0x5c   :  { %p3341_p2 = scmp.ne.s32.totalorder %s3632_s0, %s3340_s28  ;;  %p3343_p3 = scmp.lt.s32.totalorder %s3632_s0, %s4079_s3 }
  0x5d   :  { %p3344_p4 = scmp.lt.s32.totalorder %s3342_s9, %s3340_s28 }
  0x5f   :  { %p3345_p5 = por %p3344_p4, %p3343_p3 }
  0x61   :  { %p3346_p6 = pnand %p3345_p5, %p3341_p2 }
  0x63   :  { %3349 = shalt.err (!%p3346_p6)
}
  0x64   :  { %s3350_s27 = scalar_lea.vmem %s68_s8, 1024  ;;  %p3355_p8 = scmp.lt.s32.totalorder %s68_s8, %s68_s8 }
  0x65   :  { %p3351_p7 = scmp.ne.s32.totalorder %s68_s8, %s3350_s27  ;;  %p3356_p9 = scmp.lt.s32.totalorder %s3350_s27, %s3350_s27 }
  0x67   :  { %p3357_p10 = por %p3356_p9, %p3355_p8 }
  0x69   :  { %p3358_p11 = pnand %p3357_p10, %p3351_p7 }
  0x6b   :  { %3361 = shalt.err (!%p3358_p11)
}
  0x6c   :  { %73 = dma.hbm_to_vmem [thread:$0]  %s3632_s0, 1024, %s68_s8, [#allocation5], %s3441_s6, %s3441_s6, %s3442_s1  }
  0x6d   :  { %s3362_s30 = scalar_lea.hbm %s3596_s10, 2048  ;;  %s3364_s19 = scalar_lea.hbm %s4043_s11, 6144 }
  0x6e   :  { %p3363_p12 = scmp.ne.s32.totalorder %s3596_s10, %s3362_s30  ;;  %p3365_p13 = scmp.lt.s32.totalorder %s3596_s10, %s4043_s11 }
  0x6f   :  { %p3366_p0 = scmp.lt.s32.totalorder %s3364_s19, %s3362_s30 }
  0x71   :  { %p3367_p1 = por %p3366_p0, %p3365_p13 }
  0x73   :  { %p3368_p2 = pnand %p3367_p1, %p3363_p12 }
  0x75   :  { %3371 = shalt.err (!%p3368_p2)
}
  0x76   :  { %s3372_s4 = scalar_lea.vmem %s3647_s22, 2048  ;;  %p3377_p4 = scmp.lt.s32.totalorder %s3647_s22, %s3647_s22 }
  0x77   :  { %p3373_p3 = scmp.ne.s32.totalorder %s3647_s22, %s3372_s4  ;;  %p3378_p5 = scmp.lt.s32.totalorder %s3372_s4, %s3372_s4 }
  0x79   :  { %p3379_p6 = por %p3378_p5, %p3377_p4 }
  0x7b   :  { %p3380_p7 = pnand %p3379_p6, %p3373_p3 }
  0x7d   :  { %3383 = shalt.err (!%p3380_p7)
}
  0x7e   :  { %134 = dma.hbm_to_vmem [thread:$0]  %s3596_s10, 2048, %s3647_s22, [#allocation7], %s3441_s6, %s3441_s6, %s3442_s1  }
  0x7f   :  { %s3050_s8 = smul.u32 3072, %s4077_s7  ;;  %s3445_s26 = smov [#allocation11]  }
  0x80   :  { %s188_s9 = sshll.u32 %s3445_s26, 4  ;;  %s3386_s19 = scalar_lea.hbm %s4049_s17, 9216  ;;  %s189_s9 = int_to_ptr.vmem [resolvable:$true] %s188_s9 }
  0x81   :  { %s187_s27 = scalar_lea.hbm %s4049_s17, %s3050_s8 }
  0x82   :  { %s3384_s30 = scalar_lea.hbm %s187_s27, 3072  ;;  %p3387_p9 = scmp.lt.s32.totalorder %s187_s27, %s4049_s17 }
  0x83   :  { %p3385_p8 = scmp.ne.s32.totalorder %s187_s27, %s3384_s30  ;;  %p3388_p10 = scmp.lt.s32.totalorder %s3386_s19, %s3384_s30 }
  0x85   :  { %p3389_p11 = por %p3388_p10, %p3387_p9 }
  0x87   :  { %p3390_p12 = pnand %p3389_p11, %p3385_p8 }
  0x89   :  { %3393 = shalt.err (!%p3390_p12)
}
  0x8a   :  { %s3394_s10 = scalar_lea.vmem %s189_s9, 3072  ;;  %p3399_p0 = scmp.lt.s32.totalorder %s189_s9, %s189_s9 }
  0x8b   :  { %p3395_p13 = scmp.ne.s32.totalorder %s189_s9, %s3394_s10  ;;  %p3400_p1 = scmp.lt.s32.totalorder %s3394_s10, %s3394_s10 }
  0x8d   :  { %p3401_p2 = por %p3400_p1, %p3399_p0 }
  0x8f   :  { %p3402_p3 = pnand %p3401_p2, %p3395_p13 }
  0x91   :  { %3405 = shalt.err (!%p3402_p3)
}
  0x92   :  { %s3446_s22 = smov 192   ;;  %s3447_s4 = smov 12  }
  0x93   :  { %194 = dma.hbm_to_vmem [thread:$0]  %s187_s27, 3072, %s189_s9, [#allocation10], %s3446_s22, %s3446_s22, %s3447_s4  }
  0x94   :  { %s234_s8 = scalar_lea.hbm %s4053_s21, %s3607_s2  ;;  %s3448_s17 = smov [#allocation14]  }
  0x95   :  { %s235_s26 = sshll.u32 %s3448_s17, 4  ;;  %s3406_s24 = scalar_lea.hbm %s234_s8, 1024  ;;  %s236_s26 = int_to_ptr.vmem [resolvable:$true] %s235_s26 }
  0x96   :  { %p3407_p4 = scmp.ne.s32.totalorder %s234_s8, %s3406_s24  ;;  %s3408_s3 = scalar_lea.hbm %s4053_s21, 3072 }
  0x97   :  { %p3409_p5 = scmp.lt.s32.totalorder %s234_s8, %s4053_s21  ;;  %p3410_p6 = scmp.lt.s32.totalorder %s3408_s3, %s3406_s24 }
  0x99   :  { %p3411_p7 = por %p3410_p6, %p3409_p5 }
  0x9b   :  { %p3412_p8 = pnand %p3411_p7, %p3407_p4 }
  0x9d   :  { %3415 = shalt.err (!%p3412_p8)
}
  0x9e   :  { %s3416_s9 = scalar_lea.vmem %s236_s26, 1024  ;;  %p3421_p10 = scmp.lt.s32.totalorder %s236_s26, %s236_s26 }
  0x9f   :  { %p3417_p9 = scmp.ne.s32.totalorder %s236_s26, %s3416_s9  ;;  %p3422_p11 = scmp.lt.s32.totalorder %s3416_s9, %s3416_s9 }
  0xa1   :  { %p3423_p12 = por %p3422_p11, %p3421_p10 }
  0xa3   :  { %p3424_p13 = pnand %p3423_p12, %p3417_p9 }
  0xa5   :  { %3427 = shalt.err (!%p3424_p13)
}
  0xa6   :  { %241 = dma.hbm_to_vmem [thread:$0]  %s234_s8, 1024, %s236_s26, [#allocation13], %s3441_s6, %s3441_s6, %s3442_s1  }
  0xa7   :  { %3428 = dma.done.wait [#allocation5], 1024  }
  0xa8   :  { %3429 = vsyncadd [#allocation5], 4294966272 }
  0xa9   :  { %3430 = dma.done.wait [#allocation7], 4096  }
  0xaa   :  { %3431 = vsyncadd [#allocation7], 4294963200 }
  0xab   :  { %3432 = dma.done.wait [#allocation10], 4096  }
  0xac   :  { %3433 = vsyncadd [#allocation10], 4294963200 }
  0xad   :  { %3434 = dma.done.wait [#allocation13], 2048  }
  0xae   :  { %3435 = vsyncadd [#allocation13], 4294965248  ;;  %p354_p0 = scmp.lt.s32.totalorder %s4077_s7, 2  ;;  %v3449_v0 = vmov 0   ;;  %v3450_v1 = vmov 0.0   ;;  %s4080_s22 = sld [smem:[#allocation22_spill]]  ;;  %v497_v27 = vlaneseq }
  0xaf   :  { %678 = vmatprep.mubr.bf16.mxu0 %v3449_v0  ;;  %2862 = vmatprep.subr.bf16.mxu1 %v3450_v1  ;;  %s4081_s8 = sld [smem:[#allocation20_spill]]  ;;  %vm3451_vm0 = vmmov 0   ;;  %vm739_vm1 = vcmask 523264   ;;  %vm787_vm2 = vcmask 130048   ;;  %vm2016_vm11 = vcmask 122880  }
  0xb0   :  { %s4092_s7 = smov (!%p354_p0, %s4077_s7), 2  ;;  %2878 = vmatprep.mubr.msk.bf16.mxu1 %vm3451_vm0, %v3450_v1  ;;  %v3768_v28 = vshrl.u32 %v497_v27, 7  ;;  %s4082_s29 = sld [smem:[#allocation23_spill]]  ;;  %vm2493_vm12 = vcmask 24576  }
  0xb1   :  { %s3051_s15 = smul.u32 192, %s4092_s7  ;;  %s4083_s19 = sld [smem:[#allocation21_spill]] }
  0xb2   :  { %s3052_s17 = smul.u32 3, %s4092_s7  ;;  %v3776_v29 = vsub.s32 1, %v3768_v28  ;;  %v3780_v36 = vsub.s32 0, %v3768_v28  ;;  %v507_v45 = vsub.s32 2, %v3768_v28  ;;  %s4084_s2 = sld [smem:[#allocation25_spill]] }
  0xb3   :  { %s4085_s28 = sld [smem:[#allocation26_spill]]  ;;  %s393_s9 = scalar_lea.vmem %s4044_s12, %s4092_s7 }
  0xb4   :  { %s3719_s4 = scalar_lea.vmem %s4080_s22, %s3051_s15  ;;  %s4086_s11 = sld [smem:[#allocation27_spill]] }
  0xb5   :  { %v3069_v2 = vld [vmem:[%s3719_s4 + $0xac] ss:$12 sps:$4 sm:$0xff]   ;;  %v3071_v3 = vld [vmem:[%s3719_s4 + $0xa8] ss:$12 sps:$4 sm:$0xff]   ;;  %v3074_v5 = vld [vmem:[%s3719_s4 + $0x90] ss:$12 sps:$4 sm:$0xff]   ;;  %s403_s15 = scalar_lea.vmem %s4046_s14, %s4092_s7  ;;  %s422_s26 = scalar_lea.vmem %s4052_s20, %s4092_s7 }
  0xb6   :  { %646 = vmatprep.subr.bf16.mxu0 %v3069_v2  ;;  %v3072_v4 = vld [vmem:[%s3719_s4 + $0x94] ss:$12 sps:$4 sm:$0xff]   ;;  %v3075_v6 = vld [vmem:[%s3719_s4 + $0x7c] ss:$12 sps:$4 sm:$0xff]   ;;  %v3077_v7 = vld [vmem:[%s3719_s4 + $0x78] ss:$12 sps:$4 sm:$0xff]   ;;  %s364_s30 = scalar_lea.vmem %s4082_s29, %s3052_s17 }
  0xb7   :  { %647 = vmatpush1.bf16.msra.mxu0 %v3071_v3  ;;  %v3078_v8 = vld [vmem:[%s3719_s4 + $0x64] ss:$12 sps:$4 sm:$0xff]   ;;  %v3080_v9 = vld [vmem:[%s3719_s4 + $0x60] ss:$12 sps:$4 sm:$0xff]   ;;  %v3083_v13 = vld [vmem:[%s3719_s4 + $0x48] ss:$12 sps:$4 sm:$0xff]  }
  0xb8   :  { %648 = vmatprep.subr.bf16.mxu0 %v3072_v4  ;;  %v3094_v10 = vld [vmem:[%s3719_s4 + $0xb0] ss:$12 sps:$4 sm:$0xff]   ;;  %v3081_v11 = vld [vmem:[%s3719_s4 + $0x4c] ss:$12 sps:$4 sm:$0xff]   ;;  %v3084_v14 = vld [vmem:[%s3719_s4 + $0x34] ss:$12 sps:$4 sm:$0xff]   ;;  %s370_s27 = scalar_lea.vmem %s4084_s2, %s4092_s7  ;;  %s398_s2 = scalar_lea.vmem %s4045_s13, %s4092_s7 }
  0xb9   :  { %2863 = vmatpush3.bf16.msra.mxu1 %v3094_v10  ;;  %v3095_v12 = vld [vmem:[%s3719_s4 + $0x98] ss:$12 sps:$4 sm:$0xff]   ;;  %v3086_v15 = vld [vmem:[%s3719_s4 + $0x30] ss:$12 sps:$4 sm:$0xff]   ;;  %v3096_v16 = vld [vmem:[%s3719_s4 + $0x80] ss:$12 sps:$4 sm:$0xff]   ;;  %s375_s10 = scalar_lea.vmem %s4085_s28, %s4092_s7 }
  0xba   :  { %2864 = vmatprep.subr.bf16.mxu1 %v3450_v1  ;;  %v3087_v17 = vld [vmem:[%s3719_s4 + $0x1c] ss:$12 sps:$4 sm:$0xff]   ;;  %v3089_v19 = vld [vmem:[%s3719_s4 + $0x18] ss:$12 sps:$4 sm:$0xff]   ;;  %v3092_v22 = vld [vmem:[%s3719_s4] ss:$12 sps:$4 sm:$0xff]   ;;  %s380_s0 = scalar_lea.vmem %s4086_s11, %s4092_s7 }
  0xbb   :  { %649 = vmatpush1.bf16.msra.mxu0 %v3074_v5  ;;  %v3097_v18 = vld [vmem:[%s3719_s4 + $0x68] ss:$12 sps:$4 sm:$0xff]   ;;  %v3090_v20 = vld [vmem:[%s3719_s4 + $0x4] ss:$12 sps:$4 sm:$0xff]   ;;  %v3100_v25 = vld [vmem:[%s3719_s4 + $0x20] ss:$12 sps:$4 sm:$0xff]  }
  0xbc   :  { %650 = vmatprep.subr.bf16.mxu0 %v3075_v6  ;;  %v3098_v21 = vld [vmem:[%s3719_s4 + $0x50] ss:$12 sps:$4 sm:$0xff]   ;;  %v3748_v23 = vld [vmem:[%s4081_s8] sm:$0xff]   ;;  %v3101_v26 = vld [vmem:[%s3719_s4 + $0x8] ss:$12 sps:$4 sm:$0xff]   ;;  %s2606_s8 = sshll.u32 %s4092_s7, 1 }
  0xbd   :  { %2865 = vmatpush3.bf16.msra.mxu1 %v3095_v12  ;;  %v3099_v24 = vld [vmem:[%s3719_s4 + $0x38] ss:$12 sps:$4 sm:$0xff]   ;;  %v478_v31 = vld [vmem:[%s364_s30] sm:$0x7]  ;;  %s4087_s29 = sld [smem:[#allocation29_spill]]  ;;  %s416_s4 = scalar_lea.vmem %s4050_s18, %s3052_s17 }
  0xbe   :  { %2866 = vmatprep.subr.bf16.mxu1 %v3450_v1  ;;  %v504_v33 = vrot.slane %v478_v31, %v3776_v29  ;;  %v500_v40 = vrot.slane %v478_v31, %v3780_v36  ;;  %v508_v46 = vrot.slane %v478_v31, %v507_v45  ;;  %v3798_v54 = vld [vmem:[%s4083_s19] sm:$0x1] }
  0xbf   :  { %651 = vmatpush1.bf16.msra.mxu0 %v3077_v7  ;;  %v737_v55 = vrot.slane %v3798_v54, %v3780_v36 }
  0xc0   :  { %652 = vmatprep.subr.bf16.mxu0 %v3078_v8 }
  0xc1   :  { %2867 = vmatpush3.bf16.msra.mxu1 %v3096_v16 }
  0xc2   :  { %2868 = vmatprep.subr.bf16.mxu1 %v3450_v1 }
  0xc3   :  { %653 = vmatpush1.bf16.msra.mxu0 %v3080_v9  ;;  %s387_s30 = scalar_lea.vmem %s4087_s29, %s2606_s8  ;;  %s4088_s29 = sld [smem:[#allocation30_spill]] }
  0xc4   :  { %654 = vmatprep.subr.bf16.mxu0 %v3081_v11 }
  0xc5   :  { %2869 = vmatpush3.bf16.msra.mxu1 %v3097_v18 }
  0xc6   :  { %2870 = vmatprep.subr.bf16.mxu1 %v3450_v1 }
  0xc7   :  { %655 = vmatpush1.bf16.msra.mxu0 %v3083_v13 }
  0xc8   :  { %656 = vmatprep.subr.bf16.mxu0 %v3084_v14 }
  0xc9   :  { %2871 = vmatpush3.bf16.msra.mxu1 %v3098_v21 }
  0xca   :  { %2872 = vmatprep.subr.bf16.mxu1 %v3450_v1 }
  0xcb   :  { %657 = vmatpush1.bf16.msra.mxu0 %v3086_v15 }
  0xcc   :  { %658 = vmatprep.subr.bf16.mxu0 %v3087_v17 }
  0xcd   :  { %2873 = vmatpush3.bf16.msra.mxu1 %v3099_v24 }
  0xce   :  { %2874 = vmatprep.subr.bf16.mxu1 %v3450_v1 }
  0xcf   :  { %659 = vmatpush1.bf16.msra.mxu0 %v3089_v19 }
  0xd0   :  { %660 = vmatprep.subr.bf16.mxu0 %v3090_v20 }
  0xd1   :  { %2875 = vmatpush3.bf16.msra.mxu1 %v3100_v25 }
  0xd2   :  { %2876 = vmatprep.subr.bf16.mxu1 %v3450_v1 }
  0xd3   :  { %661 = vmatpush1.bf16.msra.mxu0 %v3092_v22 }
  0xd4   :  { %2906 = vmatprep.subr.bf16.mxu0 %v3450_v1 }
  0xd5   :  { %2877 = vmatpush3.bf16.msra.mxu1 %v3101_v26 }
  0xd6   :  { %679 = vmatmul.mubr.bf16.vlgmr.msra.gmra.mxu0 %v3748_v23  ;;  %2882 = vmatprep.subr.bf16.mxu1 %v3450_v1 }
  0xd7   :  { %2922 = vmatprep.mubr.msk.bf16.mxu0 %vm3451_vm0, %v3450_v1 }
  0xd8   :  { %2879 = vmatmul.mubr.bf16.vlgmr.msra.gmra.mxu1 %v3748_v23 }
  0xd9   :  { %2884 = vmatprep.mubr.msk.bf16.mxu1 %vm3451_vm0, %v3450_v1 }
 0x196   :  { %v680_v30 = vpop.f32.mrf.mxu0 }
 0x197   :  { %v681_v43 = vadd.f32 %v680_v30, %v500_v40 }
 0x198   :  { %v682_v32 = vpop.f32.mrf.mxu0  ;;  %v723_v47 = vpop.f32.mrf.mxu1 }
 0x199   :  { %v683_v37 = vadd.f32 %v682_v32, %v504_v33  ;;  %v724_v49 = vadd.f32 %v723_v47, %v508_v46 }
 0x19a   :  { %v684_v34 = vpop.f32.mrf.mxu0  ;;  %v2880_v48 = vpop.f32.mrf.mxu1 }
 0x19b   :  { %v685_v42 = vadd.f32 %v684_v34, %v500_v40 }
 0x19c   :  { %v686_v35 = vpop.f32.mrf.mxu0  ;;  %v726_v50 = vpop.f32.mrf.mxu1 }
 0x19d   :  { %v687_v38 = vadd.f32 %v686_v35, %v504_v33  ;;  %v730_v44 = vpack.c.bf16 %v685_v42, %v681_v43  ;;  %v727_v51 = vadd.f32 %v726_v50, %v508_v46 }
 0x19e   :  { %v2881_v52 = vpop.f32.mrf.mxu1 }
 0x19f   :  { %v731_v39 = vpack.c.bf16 %v687_v38, %v683_v37  ;;  %v3791_v53 = vpack.c.bf16 %v727_v51, %v724_v49 }
 0x1a1   :  { %v744_v41 = vsel %vm739_vm1, %v731_v39, 0 }
 0x1a2   :  { %2883 = vmatpush3.bf16.xpose.msra.mxu1 %v744_v41 }
 0x1a3   :  { %2888 = vmatprep.subr.bf16.mxu1 %v3450_v1 }
 0x1a9   :  { %2885 = vmatmul.mubr.msk.bf16.vlgmr.msra.gmra.mxu1 %vm739_vm1, %v730_v44 }
 0x1aa   :  { %2890 = vmatprep.mubr.msk.bf16.mxu1 %vm3451_vm0, %v3450_v1  ;;  %2889 = vmatpush3.bf16.msra.mxu1 %v3791_v53 }
 0x1ab   :  { %2894 = vmatprep.subr.bf16.mxu1 %v3450_v1 }
 0x269   :  { %v780_v56 = vpop.f32.mrf.mxu1 }
 0x26a   :  { %v781_v57 = vadd.f32 %v780_v56, %v737_v55 }
 0x26b   :  { %v2886_v58 = vpop.f32.mrf.mxu1 }
 0x26c   :  { %v788_v59 = vsel %vm787_vm2, %v781_v57, -inf }
 0x26d   :  { %789 = vmax.xlane.f32.xlu0 %v788_v59  ;;  %v783_v60 = vpop.f32.mrf.mxu1 }
 0x26e   :  { %v784_v61 = vadd.f32 %v783_v60, %v737_v55  ;;  %v3102_v60 = vld [vmem:[#allocation4 + $0x38] sm:$0xff]  }
 0x26f   :  { %v2887_v62 = vpop.f32.mrf.mxu1  ;;  %2907 = vmatpush3.bf16.msra.mxu0 %v3102_v60 }
 0x270   :  { %v791_v63 = vsel %vm787_vm2, %v784_v61, -inf  ;;  %2908 = vmatprep.subr.bf16.mxu0 %v3450_v1  ;;  %v3105_v62 = vld [vmem:[#allocation4 + $0x20] sm:$0xff]  }
 0x271   :  { %792 = vmax.xlane.f32.xlu0 %v791_v63  ;;  %v3106_v63 = vld [vmem:[#allocation4 + $0x18] sm:$0xff]  }
 0x287   :  { %860 = vrot.lane.b32.xlu0 %v731_v39, %s3441_s6 }
 0x2f6   :  { %v790_v2 = vpop.xlane.xlu0 %789 }
 0x2f7   :  { %v794_v3 = vsub.f32 %v781_v57, %v790_v2  ;;  %v3107_v2 = vld [vmem:[#allocation4 + $0x10] sm:$0xff]  }
 0x2f9   :  { %v796_v4 = vmul.f32 1.442695, %v794_v3  ;;  %v3108_v3 = vld [vmem:[#allocation4 + $0x8] sm:$0xff]  }
 0x2fa   :  { %v793_v5 = vpop.xlane.xlu0 %792 }
 0x2fb   :  { %3215 = vpow2.f32 %v796_v4  ;;  %v795_v6 = vsub.f32 %v784_v61, %v793_v5  ;;  %v3103_v61 = vld [vmem:[#allocation4 + $0x30] sm:$0xff]   ;;  %v3109_v4 = vld [vmem:[#allocation4] sm:$0xff]  }
 0x2fc   :  { %2909 = vmatpush3.bf16.msra.mxu0 %v3103_v61 }
 0x2fd   :  { %v798_v7 = vmul.f32 1.442695, %v795_v6  ;;  %2910 = vmatprep.subr.bf16.mxu0 %v3450_v1 }
 0x2fe   :  { %v861_v18 = vpop.permute.xlu0 %860 }
 0x2ff   :  { %3217 = vpow2.f32 %v798_v7  ;;  %v866_v20 = vsel %vm739_vm1, %v861_v18, 0  ;;  %v1084_v18 = vunpack.c.h.bf16 %v3748_v23 }
 0x308   :  { %v3216_v8 = vpop.eup %3215 }
 0x309   :  { %v800_v9 = vsel %vm787_vm2, %v3216_v8, 0.0 }
 0x30a   :  { %801 = vadd.xlane.f32.xlu1 %v800_v9 }
 0x30c   :  { %v3218_v10 = vpop.eup %3217 }
 0x30d   :  { %v803_v11 = vsel %vm787_vm2, %v3218_v10, 0.0 }
 0x30e   :  { %804 = vadd.xlane.f32.xlu1 %v803_v11 }
 0x31f   :  { %857 = vrot.lane.b32.xlu1 %v730_v44, %s3441_s6 }
 0x393   :  { %v802_v12 = vpop.xlane.xlu1 %801 }
 0x394   :  { %3219 = vrcp.f32 %v802_v12  ;;  %v2638_v12 = vld [vmem:[%s370_s27] ss:$0 sm:$0xff] }
 0x397   :  { %v805_v13 = vpop.xlane.xlu1 %804 }
 0x398   :  { %3221 = vrcp.f32 %v805_v13  ;;  %v1083_v13 = vunpack.c.l.bf16 %v3748_v23 }
 0x39b   :  { %v858_v21 = vpop.permute.xlu1 %857 }
 0x3a1   :  { %v3220_v14 = vpop.eup %3219 }
 0x3a2   :  { %v808_v16 = vmul.f32 %v3220_v14, %v3216_v8 }
 0x3a5   :  { %v3222_v15 = vpop.eup %3221 }
 0x3a6   :  { %v809_v17 = vmul.f32 %v3222_v15, %v3218_v10 }
 0x3a8   :  { %v810_v19 = vpack.c.bf16 %v809_v17, %v808_v16 }
 0x3aa   :  { %2891 = vmatmul.mubr.msk.bf16.vlgmr.msra.gmra.mxu1 %vm787_vm2, %v810_v19 }
 0x3ab   :  { %2895 = vmatpush3.bf16.xpose.msra.mxu1 %v866_v20  ;;  %2896 = vmatprep.mubr.msk.bf16.mxu1 %vm3451_vm0, %v3450_v1 }
 0x3ac   :  { %2900 = vmatprep.subr.bf16.mxu1 %v3450_v1 }
 0x3b2   :  { %2897 = vmatmul.mubr.msk.bf16.vlgmr.msra.gmra.mxu1 %vm739_vm1, %v858_v21 }
 0x3b3   :  { %2902 = vmatprep.mubr.msk.bf16.mxu1 %vm3451_vm0, %v3450_v1 }
 0x46a   :  { %v3816_v22 = vpop.f32.mrf.mxu1 }
 0x46c   :  { %v2892_v24 = vpop.f32.mrf.mxu1 }
 0x46e   :  { %v3818_v25 = vpop.f32.mrf.mxu1 }
 0x46f   :  { %v855_v26 = vpack.c.bf16 %v3818_v25, %v3816_v22 }
 0x470   :  { %v2893_v27 = vpop.f32.mrf.mxu1 }
 0x472   :  { %v902_v30 = vpop.f32.mrf.mxu1 }
 0x473   :  { %v903_v31 = vadd.f32 %v902_v30, %v737_v55 }
 0x474   :  { %v2898_v32 = vpop.f32.mrf.mxu1 }
 0x475   :  { %v909_v33 = vsel %vm787_vm2, %v903_v31, -inf }
 0x476   :  { %910 = vmax.xlane.f32.xlu1 %v909_v33  ;;  %v905_v34 = vpop.f32.mrf.mxu1  ;;  %v3112_v33 = vld [vmem:[#allocation6 + $0x74] ss:$8 sps:$4 sm:$0xff]  }
 0x477   :  { %v906_v35 = vadd.f32 %v905_v34, %v737_v55  ;;  %v3110_v34 = vld [vmem:[#allocation6 + $0x70] ss:$8 sps:$4 sm:$0xff]  }
 0x478   :  { %v2899_v37 = vpop.f32.mrf.mxu1 }
 0x479   :  { %v912_v38 = vsel %vm787_vm2, %v906_v35, -inf  ;;  %v3113_v37 = vld [vmem:[#allocation6 + $0x60] ss:$8 sps:$4 sm:$0xff]  }
 0x47a   :  { %913 = vmax.xlane.f32.xlu0 %v912_v38  ;;  %v3118_v38 = vld [vmem:[#allocation6 + $0x54] ss:$8 sps:$4 sm:$0xff]  }
 0x4ff   :  { %v911_v39 = vpop.xlane.xlu1 %910 }
 0x500   :  { %v915_v40 = vsub.f32 %v903_v31, %v911_v39  ;;  %v3116_v39 = vld [vmem:[#allocation6 + $0x50] ss:$8 sps:$4 sm:$0xff]  }
 0x502   :  { %v917_v41 = vmul.f32 1.442695, %v915_v40  ;;  %v3121_v40 = vld [vmem:[#allocation6 + $0x44] ss:$8 sps:$4 sm:$0xff]  }
 0x503   :  { %v914_v42 = vpop.xlane.xlu0 %913 }
 0x504   :  { %3223 = vpow2.f32 %v917_v41  ;;  %v916_v43 = vsub.f32 %v906_v35, %v914_v42  ;;  %v3115_v35 = vld [vmem:[#allocation6 + $0x64] ss:$8 sps:$4 sm:$0xff]   ;;  %v3119_v41 = vld [vmem:[#allocation6 + $0x40] ss:$8 sps:$4 sm:$0xff]   ;;  %v3124_v42 = vld [vmem:[#allocation6 + $0x34] ss:$8 sps:$4 sm:$0xff]  }
 0x506   :  { %v919_v44 = vmul.f32 1.442695, %v916_v43  ;;  %v3122_v43 = vld [vmem:[#allocation6 + $0x30] ss:$8 sps:$4 sm:$0xff]  }
 0x508   :  { %3225 = vpow2.f32 %v919_v44  ;;  %v3127_v44 = vld [vmem:[#allocation6 + $0x24] ss:$8 sps:$4 sm:$0xff]  }
 0x511   :  { %v3224_v46 = vpop.eup %3223 }
 0x512   :  { %v921_v47 = vsel %vm787_vm2, %v3224_v46, 0.0 }
 0x513   :  { %922 = vadd.xlane.f32.xlu0 %v921_v47  ;;  %v3130_v47 = vld [vmem:[#allocation6 + $0x14] ss:$8 sps:$4 sm:$0xff]  }
 0x515   :  { %v3226_v48 = vpop.eup %3225 }
 0x516   :  { %v924_v49 = vsel %vm787_vm2, %v3226_v48, 0.0 }
 0x517   :  { %925 = vadd.xlane.f32.xlu1 %v924_v49  ;;  %v3133_v49 = vld [vmem:[#allocation6 + $0x4] ss:$8 sps:$4 sm:$0xff]  }
 0x529   :  { %933 = vrot.lane.b32.xlu0 %v3791_v53, %s3441_s6  ;;  %v3104_v53 = vld [vmem:[#allocation4 + $0x28] sm:$0xff]  }
 0x52a   :  { %2911 = vmatpush3.bf16.msra.mxu0 %v3104_v53 }
 0x52b   :  { %2912 = vmatprep.subr.bf16.mxu0 %v3450_v1 }
 0x52e   :  { %2913 = vmatpush3.bf16.msra.mxu0 %v3105_v62 }
 0x52f   :  { %2914 = vmatprep.subr.bf16.mxu0 %v3450_v1 }
 0x532   :  { %2915 = vmatpush3.bf16.msra.mxu0 %v3106_v63 }
 0x533   :  { %2916 = vmatprep.subr.bf16.mxu0 %v3450_v1 }
 0x536   :  { %2917 = vmatpush3.bf16.msra.mxu0 %v3107_v2 }
 0x537   :  { %2918 = vmatprep.subr.bf16.mxu0 %v3450_v1 }
 0x53a   :  { %2919 = vmatpush3.bf16.msra.mxu0 %v3108_v3 }
 0x53b   :  { %2920 = vmatprep.subr.bf16.mxu0 %v3450_v1 }
 0x53e   :  { %2921 = vmatpush3.bf16.msra.mxu0 %v3109_v4 }
 0x59c   :  { %v923_v50 = vpop.xlane.xlu0 %922 }
 0x59d   :  { %3227 = vrcp.f32 %v923_v50  ;;  %v3131_v50 = vld [vmem:[#allocation6] ss:$8 sps:$4 sm:$0xff]  }
 0x5a0   :  { %v926_v51 = vpop.xlane.xlu1 %925  ;;  %v934_v52 = vpop.permute.xlu0 %933 }
 0x5a1   :  { %3229 = vrcp.f32 %v926_v51  ;;  %2901 = vmatpush3.bf16.msra.mxu1 %v934_v52 }
 0x5a2   :  { %1252 = vmatprep.subr.bf16.mxu1 %v3112_v33  ;;  %v3148_v33 = vld [vmem:[#allocation8 + $0x40] sm:$0xff]  }
 0x5aa   :  { %v3228_v55 = vpop.eup %3227 }
 0x5ab   :  { %v929_v57 = vmul.f32 %v3228_v55, %v3224_v46  ;;  %v3125_v46 = vld [vmem:[#allocation6 + $0x20] ss:$8 sps:$4 sm:$0xff]  }
 0x5ae   :  { %v3230_v56 = vpop.eup %3229 }
 0x5af   :  { %v930_v58 = vmul.f32 %v3230_v56, %v3226_v48  ;;  %v3128_v48 = vld [vmem:[#allocation6 + $0x10] ss:$8 sps:$4 sm:$0xff]  }
 0x5b1   :  { %v931_v59 = vpack.c.bf16 %v930_v58, %v929_v57 }
 0x5b3   :  { %2903 = vmatmul.mubr.msk.bf16.vlgmr.msra.gmra.mxu1 %vm787_vm2, %v931_v59 }
 0x5b4   :  { %1284 = vmatprep.mubr.bf16.mxu1 %v3449_v0  ;;  %1253 = vmatpush1.bf16.msra.mxu1 %v3110_v34  ;;  %v3149_v34 = vld [vmem:[#allocation8] sm:$0xff]  }
 0x5b5   :  { %1254 = vmatprep.subr.bf16.mxu1 %v3115_v35  ;;  %v1160_v35 = vld [vmem:[%s387_s30] sm:$0x3]  ;;  %s428_s30 = scalar_lea.vmem %s4088_s29, %s4092_s7 }
 0x5b8   :  { %1255 = vmatpush1.bf16.msra.mxu1 %v3113_v37  ;;  %v1165_v37 = vrot.slane %v1160_v35, %v3780_v36 }
 0x5b9   :  { %1256 = vmatprep.subr.bf16.mxu1 %v3118_v38  ;;  %v1169_v38 = vrot.slane %v1160_v35, %v3776_v29 }
 0x5bc   :  { %1257 = vmatpush1.bf16.msra.mxu1 %v3116_v39 }
 0x5bd   :  { %1258 = vmatprep.subr.bf16.mxu1 %v3121_v40 }
 0x5c0   :  { %1259 = vmatpush1.bf16.msra.mxu1 %v3119_v41 }
 0x5c1   :  { %1260 = vmatprep.subr.bf16.mxu1 %v3124_v42 }
 0x5c4   :  { %1261 = vmatpush1.bf16.msra.mxu1 %v3122_v43 }
 0x5c5   :  { %1262 = vmatprep.subr.bf16.mxu1 %v3127_v44 }
 0x5c8   :  { %1263 = vmatpush1.bf16.msra.mxu1 %v3125_v46 }
 0x5c9   :  { %1264 = vmatprep.subr.bf16.mxu1 %v3130_v47 }
 0x5cc   :  { %1265 = vmatpush1.bf16.msra.mxu1 %v3128_v48 }
 0x5cd   :  { %1266 = vmatprep.subr.bf16.mxu1 %v3133_v49 }
 0x5d0   :  { %1267 = vmatpush1.bf16.msra.mxu1 %v3131_v50 }
 0x5d1   :  { %2926 = vmatprep.subr.bf16.mxu1 %v3450_v1 }
 0x673   :  { %v973_v5 = vpop.f32.mrf.mxu1 }
 0x675   :  { %v2904_v6 = vpop.f32.mrf.mxu1 }
 0x676   :  { %v2647_v6 = vld [vmem:[%s375_s10] ss:$0 sm:$0xff]  ;;  %s409_s10 = scalar_lea.vmem %s4048_s16, %s4092_s7 }
 0x677   :  { %v976_v7 = vpop.f32.mrf.mxu1 }
 0x678   :  { %v980_v8 = vpack.c.bf16 %v976_v7, %v973_v5 }
 0x679   :  { %v2905_v9 = vpop.f32.mrf.mxu1 }
 0x67a   :  { %982 = vrot.lane.b32.xlu1 %v980_v8, %s3441_s6 }
 0x6ec   :  { %v983_v10 = vpop.permute.xlu1 %982 }
 0x6ed   :  { %v986_v11 = vsel %vm739_vm1, %v855_v26, %v983_v10 }
 0x6ee   :  { %2923 = vmatmul.mubr.bf16.vlgmr.msra.gmra.mxu0 %v986_v11 }
 0x7ae   :  { %v1076_v14 = vpop.f32.mrf.mxu0 }
 0x7af   :  { %v1077_v15 = vadd.f32 %v2638_v12, %v1076_v14 }
 0x7b0   :  { %v2924_v16 = vpop.f32.mrf.mxu0 }
 0x7b1   :  { %v1085_v17 = vadd.f32 %v1083_v13, %v1077_v15 }
 0x7b2   :  { %v1079_v19 = vpop.f32.mrf.mxu0 }
 0x7b3   :  { %v1080_v20 = vadd.f32 %v2638_v12, %v1079_v19  ;;  %1089 = vadd.xlane.f32.xlu1 %v1085_v17  ;;  %v2648_v12 = vld [vmem:[%s380_s0] ss:$0 sm:$0xff]  ;;  %v3136_v19 = vld [vmem:[#allocation8 + $0x70] sm:$0xff]  }
 0x7b4   :  { %v2925_v21 = vpop.f32.mrf.mxu0 }
 0x7b5   :  { %v1086_v22 = vadd.f32 %v1084_v18, %v1080_v20  ;;  %v3135_v18 = vld [vmem:[#allocation8 + $0x38] sm:$0xff]   ;;  %v3137_v20 = vld [vmem:[#allocation8 + $0x30] sm:$0xff]   ;;  %v3138_v21 = vld [vmem:[#allocation8 + $0x68] sm:$0xff]  }
 0x7b7   :  { %1091 = vadd.xlane.f32.xlu0 %v1086_v22 }
 0x83c   :  { %v1090_v24 = vpop.xlane.xlu1 %1089 }
 0x83d   :  { %v1094_v25 = vmul.f32 0.0078125, %v1090_v24  ;;  %v3140_v24 = vld [vmem:[#allocation8 + $0x60] sm:$0xff]  }
 0x83f   :  { %v3848_v26 = vsub.f32 %v1085_v17, %v1094_v25  ;;  %v3134_v17 = vld [vmem:[#allocation8 + $0x78] sm:$0xff]   ;;  %v3141_v25 = vld [vmem:[#allocation8 + $0x20] sm:$0xff]  }
 0x840   :  { %v1092_v27 = vpop.xlane.xlu0 %1091  ;;  %2787 = vmatprep.subr.bf16.mxu0 %v3134_v17 }
 0x841   :  { %v1095_v30 = vmul.f32 0.0078125, %v1092_v27  ;;  %v1098_v31 = vmul.f32 %v3848_v26, %v3848_v26  ;;  %v1131_v8 = vmul.f32 %v2647_v6, %v3848_v26  ;;  %2788 = vmatpush3.bf16.msra.mxu0 %v3135_v18  ;;  %v3142_v26 = vld [vmem:[#allocation8 + $0x58] sm:$0xff]  }
 0x842   :  { %2789 = vmatprep.subr.bf16.mxu0 %v3136_v19  ;;  %v3143_v27 = vld [vmem:[#allocation8 + $0x18] sm:$0xff]  }
 0x843   :  { %v3852_v32 = vsub.f32 %v1086_v22, %v1095_v30  ;;  %1100 = vadd.xlane.f32.xlu0 %v1098_v31  ;;  %v3139_v22 = vld [vmem:[#allocation8 + $0x28] sm:$0xff]   ;;  %v3144_v30 = vld [vmem:[#allocation8 + $0x50] sm:$0xff]  }
 0x844   :  { %v3145_v31 = vld [vmem:[#allocation8 + $0x10] sm:$0xff]  }
 0x845   :  { %v1099_v23 = vmul.f32 %v3852_v32, %v3852_v32  ;;  %v1132_v9 = vmul.f32 %v2647_v6, %v3852_v32  ;;  %2790 = vmatpush3.bf16.msra.mxu0 %v3137_v20  ;;  %v3146_v32 = vld [vmem:[#allocation8 + $0x48] sm:$0xff]  }
 0x846   :  { %2791 = vmatprep.subr.bf16.mxu0 %v3138_v21 }
 0x847   :  { %1102 = vadd.xlane.f32.xlu1 %v1099_v23  ;;  %v3147_v23 = vld [vmem:[#allocation8 + $0x8] sm:$0xff]  }
 0x849   :  { %2792 = vmatpush3.bf16.msra.mxu0 %v3139_v22 }
 0x84a   :  { %2793 = vmatprep.subr.bf16.mxu0 %v3140_v24 }
 0x84d   :  { %2794 = vmatpush3.bf16.msra.mxu0 %v3141_v25 }
 0x84e   :  { %2795 = vmatprep.subr.bf16.mxu0 %v3142_v26 }
 0x851   :  { %2796 = vmatpush3.bf16.msra.mxu0 %v3143_v27 }
 0x852   :  { %2797 = vmatprep.subr.bf16.mxu0 %v3144_v30 }
 0x855   :  { %2798 = vmatpush3.bf16.msra.mxu0 %v3145_v31  ;;  %v2665_v31 = vld [vmem:[%s393_s9] ss:$0 sm:$0xff]  ;;  %s4089_s9 = sld [smem:[#allocation31_spill]] }
 0x856   :  { %2799 = vmatprep.subr.bf16.mxu0 %v3146_v32 }
 0x859   :  { %2800 = vmatpush3.bf16.msra.mxu0 %v3147_v23 }
 0x85a   :  { %2801 = vmatprep.subr.bf16.mxu0 %v3148_v33 }
 0x85b   :  { %s440_s12 = scalar_lea.vmem %s4089_s9, %s4092_s7 }
 0x85d   :  { %2802 = vmatpush3.bf16.msra.mxu0 %v3149_v34 }
 0x8cc   :  { %v1101_v51 = vpop.xlane.xlu0 %1100 }
 0x8cd   :  { %v1105_v52 = vmul.f32 0.007874016, %v1101_v51 }
 0x8cf   :  { %3231 = vrsqrt.f32 %v1105_v52  ;;  %vm1109_vm3 = vcmp.eq.f32.partialorder %v1105_v52, inf  ;;  %v1112_v59 = vand.u32 2147483648, %v1105_v52  ;;  %vm1111_vm4 = vcmp.eq.f32.partialorder %v1105_v52, 0.0 }
 0x8d0   :  { %v1103_v55 = vpop.xlane.xlu1 %1102 }
 0x8d1   :  { %v1106_v56 = vmul.f32 0.007874016, %v1103_v55 }
 0x8d3   :  { %3233 = vrsqrt.f32 %v1106_v56  ;;  %vm1116_vm5 = vcmp.eq.f32.partialorder %v1106_v56, inf  ;;  %v1119_v2 = vand.u32 2147483648, %v1106_v56  ;;  %vm1118_vm6 = vcmp.eq.f32.partialorder %v1106_v56, 0.0 }
 0x8dc   :  { %v3232_v57 = vpop.eup %3231 }
 0x8dd   :  { %v1108_v58 = vmul.f32 %v3232_v57, %v1105_v52 }
 0x8df   :  { %v1110_v60 = vsel %vm1109_vm3, %v1105_v52, %v1108_v58 }
 0x8e0   :  { %v3234_v61 = vpop.eup %3233  ;;  %v1113_v53 = vsel %vm1111_vm4, %v1112_v59, %v1110_v60 }
 0x8e1   :  { %v1121_v62 = vadd.f32 1e-06, %v1113_v53  ;;  %v1115_v63 = vmul.f32 %v3234_v61, %v1106_v56 }
 0x8e3   :  { %3235 = vrcp.f32 %v1121_v62  ;;  %v1117_v3 = vsel %vm1116_vm5, %v1106_v56, %v1115_v63 }
 0x8e4   :  { %v1120_v4 = vsel %vm1118_vm6, %v1119_v2, %v1117_v3 }
 0x8e5   :  { %v1122_v5 = vadd.f32 1e-06, %v1120_v4 }
 0x8e7   :  { %3237 = vrcp.f32 %v1122_v5 }
 0x8f0   :  { %v3236_v7 = vpop.eup %3235 }
 0x8f1   :  { %v1133_v10 = vmul.f32 %v3236_v7, %v1131_v8 }
 0x8f3   :  { %v3867_v14 = vadd.f32 %v2648_v12, %v1133_v10 }
 0x8f4   :  { %v3238_v11 = vpop.eup %3237 }
 0x8f5   :  { %v1134_v13 = vmul.f32 %v3238_v11, %v1132_v9 }
 0x8f7   :  { %v3869_v15 = vadd.f32 %v2648_v12, %v1134_v13 }
 0x8f9   :  { %v1143_v16 = vpack.c.bf16 %v3869_v15, %v3867_v14 }
 0x8fb   :  { %1285 = vmatmul.mubr.bf16.vlgmr.msra.gmra.mxu1 %v1143_v16 }
 0x8fc   :  { %2942 = vmatprep.mubr.msk.bf16.mxu1 %vm3451_vm0, %v3450_v1 }
 0x9bb   :  { %v1286_v39 = vpop.f32.mrf.mxu1 }
 0x9bc   :  { %v1287_v40 = vadd.f32 %v1286_v39, %v1165_v37 }
 0x9bd   :  { %v1288_v41 = vpop.f32.mrf.mxu1 }
 0x9be   :  { %v1299_v42 = vmul.f32 0.044715, %v1287_v40  ;;  %v1289_v43 = vadd.f32 %v1288_v41, %v1169_v38  ;;  %v1295_v20 = vmul.f32 0.5, %v1287_v40 }
 0x9bf   :  { %v1290_v44 = vpop.f32.mrf.mxu1 }
 0x9c0   :  { %v1303_v46 = vmul.f32 %v1299_v42, %v1287_v40  ;;  %v1300_v47 = vmul.f32 0.044715, %v1289_v43  ;;  %v1291_v48 = vadd.f32 %v1290_v44, %v1165_v37  ;;  %v1296_v17 = vmul.f32 0.5, %v1289_v43 }
 0x9c1   :  { %v1292_v49 = vpop.f32.mrf.mxu1 }
 0x9c2   :  { %v1307_v50 = vmul.f32 %v1303_v46, %v1287_v40  ;;  %v1304_v51 = vmul.f32 %v1300_v47, %v1289_v43  ;;  %v1301_v52 = vmul.f32 0.044715, %v1291_v48  ;;  %v1293_v55 = vadd.f32 %v1292_v49, %v1169_v38  ;;  %v3152_v49 = vld [vmem:[#allocation9 + $0x28] sm:$0xff]  }
 0x9c3   :  { %v1297_v13 = vmul.f32 0.5, %v1291_v48 }
 0x9c4   :  { %v1311_v56 = vadd.f32 %v1307_v50, %v1287_v40  ;;  %v1308_v57 = vmul.f32 %v1304_v51, %v1289_v43  ;;  %v1305_v58 = vmul.f32 %v1301_v52, %v1291_v48  ;;  %v1302_v59 = vmul.f32 0.044715, %v1293_v55  ;;  %v3153_v50 = vld [vmem:[#allocation9 + $0x20] sm:$0xff]   ;;  %v3154_v51 = vld [vmem:[#allocation9 + $0x18] sm:$0xff]   ;;  %v3155_v52 = vld [vmem:[#allocation9 + $0x10] sm:$0xff]  }
 0x9c5   :  { %v1298_v18 = vmul.f32 0.5, %v1293_v55 }
 0x9c6   :  { %v1309_v60 = vmul.f32 %v1305_v58, %v1291_v48  ;;  %v1306_v61 = vmul.f32 %v1302_v59, %v1293_v55  ;;  %v1312_v53 = vadd.f32 %v1308_v57, %v1289_v43  ;;  %v1315_v62 = vmul.f32 0.7978846, %v1311_v56  ;;  %v3157_v56 = vld [vmem:[#allocation9] sm:$0xff]   ;;  %v3158_v57 = vld [vmem:[#allocation11 + $0xa8] ss:$12 sps:$4 sm:$0xff]  }
 0x9c7   :  { %v3160_v58 = vld [vmem:[#allocation11 + $0xac] ss:$12 sps:$4 sm:$0xff]   ;;  %v3164_v59 = vld [vmem:[#allocation11 + $0x94] ss:$12 sps:$4 sm:$0xff]  }
 0x9c8   :  { %v1313_v63 = vadd.f32 %v1309_v60, %v1291_v48  ;;  %v1310_v2 = vmul.f32 %v1306_v61, %v1293_v55  ;;  %v1316_v3 = vmul.f32 0.7978846, %v1312_v53  ;;  %v3150_v48 = vld [vmem:[#allocation9 + $0x38] sm:$0xff]   ;;  %1884 = vmatprep.subr.bf16.mxu0 %v3160_v58 }
 0x9c9   :  { %2927 = vmatpush3.bf16.msra.mxu1 %v3150_v48  ;;  %v3162_v60 = vld [vmem:[#allocation11 + $0x90] ss:$12 sps:$4 sm:$0xff]   ;;  %v3166_v53 = vld [vmem:[#allocation11 + $0x78] ss:$12 sps:$4 sm:$0xff]   ;;  %v3189_v48 = vld [vmem:[#allocation11 + $0x8] ss:$12 sps:$4 sm:$0xff]  }
 0x9ca   :  { %v1317_v4 = vmul.f32 0.7978846, %v1313_v63  ;;  %v1314_v5 = vadd.f32 %v1310_v2, %v1293_v55  ;;  %3239 = vtanh.f32 %v1316_v3  ;;  %2928 = vmatprep.subr.bf16.mxu1 %v3450_v1  ;;  %v3156_v55 = vld [vmem:[#allocation9 + $0x8] sm:$0xff]  }
 0x9cb   :  { %3241 = vtanh.f32 %v1315_v62  ;;  %v3168_v61 = vld [vmem:[#allocation11 + $0x7c] ss:$12 sps:$4 sm:$0xff]  }
 0x9cc   :  { %3243 = vtanh.f32 %v1317_v4  ;;  %v1318_v6 = vmul.f32 0.7978846, %v1314_v5 }
 0x9ce   :  { %3245 = vtanh.f32 %v1318_v6 }
 0x9d7   :  { %v3240_v7 = vpop.eup %3239 }
 0x9d8   :  { %v3242_v8 = vpop.eup %3241  ;;  %v1324_v10 = vadd.f32 1.0, %v3240_v7 }
 0x9d9   :  { %v3244_v9 = vpop.eup %3243  ;;  %v1323_v16 = vadd.f32 1.0, %v3242_v8 }
 0x9da   :  { %v1325_v11 = vadd.f32 1.0, %v3244_v9  ;;  %v1328_v22 = vmul.f32 %v1324_v10, %v1296_v17 }
 0x9db   :  { %v3246_v12 = vpop.eup %3245  ;;  %v1327_v25 = vmul.f32 %v1323_v16, %v1295_v20 }
 0x9dc   :  { %v1326_v19 = vadd.f32 1.0, %v3246_v12  ;;  %v1329_v21 = vmul.f32 %v1325_v11, %v1297_v13 }
 0x9de   :  { %v1330_v24 = vmul.f32 %v1326_v19, %v1298_v18  ;;  %v1331_v27 = vpack.c.bf16 %v1329_v21, %v1327_v25  ;;  %v2682_v18 = vld [vmem:[%s398_s2] ss:$0 sm:$0xff]  ;;  %s4090_s2 = sld [smem:[#allocation32_spill]] }
 0x9df   :  { %v2683_v25 = vld [vmem:[%s403_s15] ss:$0 sm:$0xff] }
 0x9e0   :  { %v1332_v26 = vpack.c.bf16 %v1330_v24, %v1328_v22 }
 0x9e2   :  { %1500 = vmatprep.mubr.bf16.mxu0 %v1332_v26 }
 0x9e3   :  { %1501 = vmatmul.mubr.bf16.vlgmr.msra.gmra.mxu0 %v1331_v27 }
 0x9e4   :  { %1916 = vmatprep.mubr.bf16.mxu0 %v3449_v0  ;;  %1885 = vmatpush1.bf16.msra.mxu0 %v3158_v57 }
 0x9e5   :  { %1886 = vmatprep.subr.bf16.mxu0 %v3164_v59 }
 0x9e8   :  { %1887 = vmatpush1.bf16.msra.mxu0 %v3162_v60  ;;  %v1722_v60 = vld [vmem:[%s416_s4] sm:$0x7] }
 0x9e9   :  { %1888 = vmatprep.subr.bf16.mxu0 %v3168_v61  ;;  %v1744_v61 = vrot.slane %v1722_v60, %v3780_v36 }
 0x9ec   :  { %1889 = vmatpush1.bf16.msra.mxu0 %v3166_v53 }
 0xaa3   :  { %v2803_v30 = vpop.f32.mrf.mxu0 }
 0xaa5   :  { %v2804_v32 = vpop.f32.mrf.mxu0 }
 0xaa6   :  { %v2805_v23 = vadd.f32 %v2804_v32, %v2803_v30 }
 0xaa7   :  { %v2806_v33 = vpop.f32.mrf.mxu0 }
 0xaa8   :  { %v1503_v34 = vadd.f32 %v2805_v23, %v2665_v31  ;;  %v3165_v23 = vld [vmem:[#allocation11 + $0x98] ss:$12 sps:$4 sm:$0xff]  }
 0xaa9   :  { %v2807_v35 = vpop.f32.mrf.mxu0 }
 0xaaa   :  { %v2808_v37 = vadd.f32 %v2807_v35, %v2806_v33  ;;  %v1509_v38 = vadd.f32 %v1503_v34, %v3867_v14  ;;  %v3169_v33 = vld [vmem:[#allocation11 + $0x80] ss:$12 sps:$4 sm:$0xff]   ;;  %v3172_v34 = vld [vmem:[#allocation11 + $0x64] ss:$12 sps:$4 sm:$0xff]  }
 0xaab   :  { %v3170_v35 = vld [vmem:[#allocation11 + $0x60] ss:$12 sps:$4 sm:$0xff]   ;;  %1890 = vmatprep.subr.bf16.mxu0 %v3172_v34 }
 0xaac   :  { %v1506_v39 = vadd.f32 %v2808_v37, %v2665_v31  ;;  %1513 = vadd.xlane.f32.xlu0 %v1509_v38  ;;  %v3161_v31 = vld [vmem:[#allocation11 + $0xb0] ss:$12 sps:$4 sm:$0xff]   ;;  %v3173_v37 = vld [vmem:[#allocation11 + $0x68] ss:$12 sps:$4 sm:$0xff]   ;;  %1891 = vmatpush1.bf16.msra.mxu0 %v3170_v35 }
 0xaae   :  { %v1510_v40 = vadd.f32 %v1506_v39, %v3869_v15  ;;  %v3151_v15 = vld [vmem:[#allocation9 + $0x30] sm:$0xff]  }
 0xaaf   :  { %2929 = vmatpush3.bf16.msra.mxu1 %v3151_v15  ;;  %v3174_v39 = vld [vmem:[#allocation11 + $0x48] ss:$12 sps:$4 sm:$0xff]   ;;  %v2686_v15 = vld [vmem:[%s409_s10] ss:$0 sm:$0xff] }
 0xab0   :  { %1515 = vadd.xlane.f32.xlu1 %v1510_v40  ;;  %2930 = vmatprep.subr.bf16.mxu1 %v3450_v1 }
 0xab3   :  { %2931 = vmatpush3.bf16.msra.mxu1 %v3152_v49 }
 0xab4   :  { %2932 = vmatprep.subr.bf16.mxu1 %v3450_v1 }
 0xab7   :  { %2933 = vmatpush3.bf16.msra.mxu1 %v3153_v50 }
 0xab8   :  { %2934 = vmatprep.subr.bf16.mxu1 %v3450_v1 }
 0xabb   :  { %2935 = vmatpush3.bf16.msra.mxu1 %v3154_v51 }
 0xabc   :  { %2936 = vmatprep.subr.bf16.mxu1 %v3450_v1 }
 0xabf   :  { %2937 = vmatpush3.bf16.msra.mxu1 %v3155_v52 }
 0xac0   :  { %2938 = vmatprep.subr.bf16.mxu1 %v3450_v1 }
 0xac3   :  { %2939 = vmatpush3.bf16.msra.mxu1 %v3156_v55 }
 0xac4   :  { %2940 = vmatprep.subr.bf16.mxu1 %v3450_v1 }
 0xac7   :  { %2941 = vmatpush3.bf16.msra.mxu1 %v3157_v56 }
 0xac8   :  { %2946 = vmatprep.subr.bf16.mxu1 %v3450_v1 }
 0xb35   :  { %v1514_v0 = vpop.xlane.xlu0 %1513 }
 0xb36   :  { %v1517_v41 = vmul.f32 0.0078125, %v1514_v0  ;;  %v3180_v0 = vld [vmem:[#allocation11 + $0x34] ss:$12 sps:$4 sm:$0xff]  }
 0xb38   :  { %v3888_v42 = vsub.f32 %v1509_v38, %v1517_v41  ;;  %v3176_v38 = vld [vmem:[#allocation11 + $0x4c] ss:$12 sps:$4 sm:$0xff]   ;;  %v3178_v41 = vld [vmem:[#allocation11 + $0x30] ss:$12 sps:$4 sm:$0xff]  }
 0xb39   :  { %v1516_v43 = vpop.xlane.xlu1 %1515  ;;  %1892 = vmatprep.subr.bf16.mxu0 %v3176_v38 }
 0xb3a   :  { %v1518_v44 = vmul.f32 0.0078125, %v1516_v43  ;;  %v1521_v46 = vmul.f32 %v3888_v42, %v3888_v42  ;;  %v1553_v20 = vmul.f32 %v2682_v18, %v3888_v42  ;;  %1893 = vmatpush1.bf16.msra.mxu0 %v3174_v39  ;;  %v3181_v42 = vld [vmem:[#allocation11 + $0x38] ss:$12 sps:$4 sm:$0xff]   ;;  %v3184_v43 = vld [vmem:[#allocation11 + $0x1c] ss:$12 sps:$4 sm:$0xff]  }
 0xb3b   :  { %1894 = vmatprep.subr.bf16.mxu0 %v3180_v0 }
 0xb3c   :  { %v3892_v47 = vsub.f32 %v1510_v40, %v1518_v44  ;;  %1523 = vadd.xlane.f32.xlu0 %v1521_v46  ;;  %v3177_v40 = vld [vmem:[#allocation11 + $0x50] ss:$12 sps:$4 sm:$0xff]   ;;  %v3182_v44 = vld [vmem:[#allocation11 + $0x18] ss:$12 sps:$4 sm:$0xff]   ;;  %v3185_v46 = vld [vmem:[#allocation11 + $0x20] ss:$12 sps:$4 sm:$0xff]  }
 0xb3e   :  { %v1522_v14 = vmul.f32 %v3892_v47, %v3892_v47  ;;  %v1554_v21 = vmul.f32 %v2682_v18, %v3892_v47  ;;  %1895 = vmatpush1.bf16.msra.mxu0 %v3178_v41  ;;  %v3188_v47 = vld [vmem:[#allocation11 + $0x4] ss:$12 sps:$4 sm:$0xff]  }
 0xb3f   :  { %1896 = vmatprep.subr.bf16.mxu0 %v3184_v43 }
 0xb40   :  { %1525 = vadd.xlane.f32.xlu1 %v1522_v14  ;;  %v3186_v14 = vld [vmem:[#allocation11] ss:$12 sps:$4 sm:$0xff]  }
 0xb42   :  { %1897 = vmatpush1.bf16.msra.mxu0 %v3182_v44 }
 0xb43   :  { %1898 = vmatprep.subr.bf16.mxu0 %v3188_v47 }
 0xb46   :  { %1899 = vmatpush1.bf16.msra.mxu0 %v3186_v14 }
 0xb47   :  { %2966 = vmatprep.subr.bf16.mxu0 %v3450_v1 }
 0xbc5   :  { %v1524_v62 = vpop.xlane.xlu0 %1523 }
 0xbc6   :  { %v1527_v63 = vmul.f32 0.007874016, %v1524_v62 }
 0xbc8   :  { %3247 = vrsqrt.f32 %v1527_v63  ;;  %vm1531_vm7 = vcmp.eq.f32.partialorder %v1527_v63, inf  ;;  %v1534_v6 = vand.u32 2147483648, %v1527_v63  ;;  %vm1533_vm8 = vcmp.eq.f32.partialorder %v1527_v63, 0.0 }
 0xbc9   :  { %v1526_v2 = vpop.xlane.xlu1 %1525 }
 0xbca   :  { %v1528_v3 = vmul.f32 0.007874016, %v1526_v2  ;;  %v1752_v2 = vrot.slane %v1722_v60, %v507_v45 }
 0xbcc   :  { %3249 = vrsqrt.f32 %v1528_v3  ;;  %vm1538_vm9 = vcmp.eq.f32.partialorder %v1528_v3, inf  ;;  %v1541_v12 = vand.u32 2147483648, %v1528_v3  ;;  %vm1540_vm10 = vcmp.eq.f32.partialorder %v1528_v3, 0.0 }
 0xbd5   :  { %v3248_v4 = vpop.eup %3247 }
 0xbd6   :  { %v1530_v5 = vmul.f32 %v3248_v4, %v1527_v63 }
 0xbd8   :  { %v1532_v7 = vsel %vm1531_vm7, %v1527_v63, %v1530_v5 }
 0xbd9   :  { %v3250_v8 = vpop.eup %3249  ;;  %v1535_v9 = vsel %vm1533_vm8, %v1534_v6, %v1532_v7  ;;  %v1748_v6 = vrot.slane %v1722_v60, %v3776_v29 }
 0xbda   :  { %v1543_v10 = vadd.f32 1e-06, %v1535_v9  ;;  %v1537_v11 = vmul.f32 %v3250_v8, %v1528_v3 }
 0xbdc   :  { %3251 = vrcp.f32 %v1543_v10  ;;  %v1539_v13 = vsel %vm1538_vm9, %v1528_v3, %v1537_v11 }
 0xbdd   :  { %v1542_v16 = vsel %vm1540_vm10, %v1541_v12, %v1539_v13 }
 0xbde   :  { %v1544_v17 = vadd.f32 1e-06, %v1542_v16 }
 0xbe0   :  { %3253 = vrcp.f32 %v1544_v17 }
 0xbe9   :  { %v3252_v19 = vpop.eup %3251 }
 0xbea   :  { %v1555_v22 = vmul.f32 %v3252_v19, %v1553_v20 }
 0xbec   :  { %v1563_v27 = vadd.f32 %v2683_v25, %v1555_v22 }
 0xbed   :  { %v3254_v24 = vpop.eup %3253 }
 0xbee   :  { %v1556_v26 = vmul.f32 %v3254_v24, %v1554_v21 }
 0xbf0   :  { %v1564_v30 = vadd.f32 %v2683_v25, %v1556_v26 }
 0xbf2   :  { %v1565_v32 = vpack.c.bf16 %v1564_v30, %v1563_v27  ;;  %v3273_v27 = vld [vmem:[%s4083_s19] sm:$0x1] }
 0xbf4   :  { %2760 = vst [vmem:[%s4057_s25] sm:$0xff] %v1565_v32   ;;  %2943 = vmatmul.mubr.bf16.vlgmr.msra.gmra.mxu1 %v1565_v32 }
 0xbf5   :  { %2947 = vmatpush3.bf16.msra.mxu1 %v3161_v31  ;;  %2962 = vmatprep.mubr.msk.bf16.mxu1 %vm3451_vm0, %v3450_v1 }
 0xbf6   :  { %2948 = vmatprep.subr.bf16.mxu1 %v3450_v1 }
 0xbf9   :  { %2949 = vmatpush3.bf16.msra.mxu1 %v3165_v23 }
 0xbfa   :  { %2950 = vmatprep.subr.bf16.mxu1 %v3450_v1 }
 0xbfd   :  { %2951 = vmatpush3.bf16.msra.mxu1 %v3169_v33 }
 0xbfe   :  { %2952 = vmatprep.subr.bf16.mxu1 %v3450_v1 }
 0xc01   :  { %2953 = vmatpush3.bf16.msra.mxu1 %v3173_v37 }
 0xc02   :  { %2954 = vmatprep.subr.bf16.mxu1 %v3450_v1 }
 0xc05   :  { %2955 = vmatpush3.bf16.msra.mxu1 %v3177_v40 }
 0xc06   :  { %2956 = vmatprep.subr.bf16.mxu1 %v3450_v1 }
 0xc09   :  { %2957 = vmatpush3.bf16.msra.mxu1 %v3181_v42 }
 0xc0a   :  { %2958 = vmatprep.subr.bf16.mxu1 %v3450_v1 }
 0xc0d   :  { %2959 = vmatpush3.bf16.msra.mxu1 %v3185_v46 }
 0xc0e   :  { %2960 = vmatprep.subr.bf16.mxu1 %v3450_v1 }
 0xc11   :  { %2961 = vmatpush3.bf16.msra.mxu1 %v3189_v48 }
 0xc12   :  { %2972 = vmatprep.subr.bf16.mxu1 %v3450_v1 }
 0xcb4   :  { %v1680_v49 = vpop.f32.mrf.mxu1 }
 0xcb5   :  { %v1681_v50 = vadd.f32 %v2686_v15, %v1680_v49 }
 0xcb6   :  { %v2944_v51 = vpop.f32.mrf.mxu1 }
 0xcb7   :  { %3255 = vtanh.f32 %v1681_v50  ;;  %v3190_v51 = vld [vmem:[#allocation12 + $0x38] sm:$0xff]  }
 0xcb8   :  { %v1683_v52 = vpop.f32.mrf.mxu1 }
 0xcb9   :  { %v1684_v55 = vadd.f32 %v2686_v15, %v1683_v52  ;;  %v3191_v52 = vld [vmem:[#allocation12 + $0x30] sm:$0xff]  }
 0xcba   :  { %v2945_v56 = vpop.f32.mrf.mxu1 }
 0xcbb   :  { %3257 = vtanh.f32 %v1684_v55  ;;  %v3192_v55 = vld [vmem:[#allocation12 + $0x28] sm:$0xff]  }
 0xcc4   :  { %v3256_v57 = vpop.eup %3255 }
 0xcc8   :  { %v3258_v58 = vpop.eup %3257 }
 0xcc9   :  { %v1689_v59 = vpack.c.bf16 %v3258_v58, %v3256_v57  ;;  %v3193_v58 = vld [vmem:[#allocation12 + $0x20] sm:$0xff]  }
 0xccb   :  { %1917 = vmatmul.mubr.bf16.vlgmr.msra.gmra.mxu0 %v1689_v59  ;;  %2963 = vmatmul.mubr.bf16.vlgmr.msra.gmra.mxu1 %v1689_v59 }
 0xccc   :  { %2968 = vmatprep.mubr.msk.bf16.mxu0 %vm3451_vm0, %v3450_v1  ;;  %2974 = vmatprep.mubr.msk.bf16.mxu1 %vm3451_vm0, %v3450_v1 }
 0xd8b   :  { %v1918_v53 = vpop.f32.mrf.mxu0  ;;  %v1960_v62 = vpop.f32.mrf.mxu1 }
 0xd8c   :  { %v1919_v63 = vadd.f32 %v1918_v53, %v1744_v61  ;;  %v1961_v9 = vadd.f32 %v1960_v62, %v1752_v2  ;;  %v3194_v61 = vld [vmem:[#allocation12 + $0x18] sm:$0xff]   ;;  %v3195_v53 = vld [vmem:[#allocation12 + $0x10] sm:$0xff]   ;;  %v3196_v62 = vld [vmem:[#allocation12 + $0x8] sm:$0xff]  }
 0xd8d   :  { %v1920_v3 = vpop.f32.mrf.mxu0  ;;  %v2964_v4 = vpop.f32.mrf.mxu1 }
 0xd8e   :  { %v1967_v5 = vpack.c.bf16 %v1919_v63, %v1919_v63  ;;  %v1921_v36 = vadd.f32 %v1920_v3, %v1748_v6  ;;  %v3197_v63 = vld [vmem:[#allocation12] sm:$0xff]   ;;  %v3199_v3 = vld [vmem:[#allocation14 + $0x30] sm:$0xff]   ;;  %v3200_v4 = vld [vmem:[#allocation14 + $0x28] sm:$0xff]  }
 0xd8f   :  { %v1922_v7 = vpop.f32.mrf.mxu0  ;;  %v1963_v8 = vpop.f32.mrf.mxu1 }
 0xd90   :  { %v1964_v10 = vadd.f32 %v1963_v8, %v1752_v2  ;;  %2074 = vrot.lane.b32.xlu1 %v1967_v5, %s3441_s6  ;;  %v3198_v2 = vld [vmem:[#allocation14 + $0x38] sm:$0xff]   ;;  %v3201_v7 = vld [vmem:[#allocation14 + $0x20] sm:$0xff]  }
 0xd91   :  { %v1923_v11 = vpop.f32.mrf.mxu0  ;;  %v2965_v12 = vpop.f32.mrf.mxu1 }
 0xd92   :  { %v1969_v13 = vpack.c.bf16 %v1964_v10, %v1961_v9  ;;  %v1924_v16 = vadd.f32 %v1923_v11, %v1748_v6  ;;  %v3202_v10 = vld [vmem:[#allocation14 + $0x18] sm:$0xff]   ;;  %v3203_v12 = vld [vmem:[#allocation14 + $0x10] sm:$0xff]  }
 0xd94   :  { %2973 = vmatpush3.bf16.msra.mxu1 %v1969_v13  ;;  %v1968_v17 = vpack.c.bf16 %v1924_v16, %v1921_v36  ;;  %v3204_v36 = vld [vmem:[#allocation14 + $0x8] sm:$0xff]  }
 0xd95   :  { %2984 = vmatprep.subr.bf16.mxu1 %v3450_v1 }
 0xd96   :  { %2077 = vrot.lane.b32.xlu0 %v1968_v17, %s3441_s6  ;;  %v1974_v28 = vsel %vm739_vm1, %v1968_v17, 0 }
 0xd97   :  { %2967 = vmatpush3.bf16.xpose.msra.mxu0 %v1974_v28  ;;  %v3205_v28 = vld [vmem:[#allocation14] sm:$0xff]  }
 0xd98   :  { %2978 = vmatprep.subr.bf16.mxu0 %v3450_v1 }
 0xd9e   :  { %2969 = vmatmul.mubr.msk.bf16.vlgmr.msra.gmra.mxu0 %vm739_vm1, %v1967_v5 }
 0xd9f   :  { %2980 = vmatprep.mubr.msk.bf16.mxu0 %vm3451_vm0, %v3450_v1 }
 0xe02   :  { %v2075_v18 = vpop.permute.xlu1 %2074 }
 0xe08   :  { %v2078_v29 = vpop.permute.xlu0 %2077 }
 0xe09   :  { %v2083_v45 = vsel %vm739_vm1, %v2078_v29, 0 }
 0xe0a   :  { %2979 = vmatpush3.bf16.xpose.msra.mxu0 %v2083_v45 }
 0xe0b   :  { %2990 = vmatprep.subr.bf16.mxu0 %v3450_v1 }
 0xe11   :  { %2981 = vmatmul.mubr.msk.bf16.vlgmr.msra.gmra.mxu0 %vm739_vm1, %v2075_v18 }
 0xe12   :  { %3006 = vmatprep.mubr.msk.bf16.mxu0 %vm3451_vm0, %v3450_v1  ;;  %2991 = vmatpush3.bf16.msra.mxu0 %v3190_v51 }
 0xe13   :  { %2992 = vmatprep.subr.bf16.mxu0 %v3450_v1 }
 0xe16   :  { %2993 = vmatpush3.bf16.msra.mxu0 %v3191_v52 }
 0xe17   :  { %2994 = vmatprep.subr.bf16.mxu0 %v3450_v1 }
 0xe1a   :  { %2995 = vmatpush3.bf16.msra.mxu0 %v3192_v55 }
 0xe1b   :  { %2996 = vmatprep.subr.bf16.mxu0 %v3450_v1 }
 0xe1e   :  { %2997 = vmatpush3.bf16.msra.mxu0 %v3193_v58 }
 0xe1f   :  { %2998 = vmatprep.subr.bf16.mxu0 %v3450_v1 }
 0xe22   :  { %2999 = vmatpush3.bf16.msra.mxu0 %v3194_v61 }
 0xe23   :  { %3000 = vmatprep.subr.bf16.mxu0 %v3450_v1 }
 0xe26   :  { %3001 = vmatpush3.bf16.msra.mxu0 %v3195_v53 }
 0xe27   :  { %3002 = vmatprep.subr.bf16.mxu0 %v3450_v1 }
 0xe2a   :  { %3003 = vmatpush3.bf16.msra.mxu0 %v3196_v62 }
 0xe2b   :  { %3004 = vmatprep.subr.bf16.mxu0 %v3450_v1 }
 0xe2e   :  { %3005 = vmatpush3.bf16.msra.mxu0 %v3197_v63 }
 0xe2f   :  { %3030 = vmatprep.subr.bf16.mxu0 %v3450_v1 }
 0xe5e   :  { %v2010_v19 = vpop.f32.mrf.mxu0 }
 0xe5f   :  { %v2011_v20 = vadd.f32 %v2010_v19, %v3798_v54  ;;  %v1739_v19 = vld [vmem:[%s422_s26] sm:$0x1] }
 0xe60   :  { %v2970_v21 = vpop.f32.mrf.mxu0 }
 0xe61   :  { %v2017_v22 = vsel %vm2016_vm11, %v2011_v20, -inf }
 0xe62   :  { %2018 = vmax.xlane.f32.xlu1 %v2017_v22  ;;  %v2013_v24 = vpop.f32.mrf.mxu0 }
 0xe64   :  { %v2971_v25 = vpop.f32.mrf.mxu0 }
 0xed1   :  { %v2119_v26 = vpop.f32.mrf.mxu0 }
 0xed2   :  { %v2120_v30 = vadd.f32 %v3273_v27, %v2119_v26 }
 0xed3   :  { %v2982_v31 = vpop.f32.mrf.mxu0 }
 0xed4   :  { %v2125_v32 = vsel %vm2016_vm11, %v2120_v30, -inf }
 0xed5   :  { %2126 = vmax.xlane.f32.xlu0 %v2125_v32  ;;  %v2122_v23 = vpop.f32.mrf.mxu0 }
 0xed7   :  { %v2983_v33 = vpop.f32.mrf.mxu0 }
 0xed8   :  { %v2297_v33 = vld [vmem:[%s428_s30] sm:$0x1] }
 0xeeb   :  { %v2019_v34 = vpop.xlane.xlu1 %2018 }
 0xeec   :  { %v2020_v54 = vsub.f32 %v2011_v20, %v2019_v34 }
 0xeee   :  { %v2021_v35 = vmul.f32 1.442695, %v2020_v54 }
 0xef0   :  { %3259 = vpow2.f32 %v2021_v35 }
 0xefd   :  { %v3260_v37 = vpop.eup %3259 }
 0xefe   :  { %v2023_v38 = vsel %vm2016_vm11, %v3260_v37, 0.0 }
 0xeff   :  { %2024 = vadd.xlane.f32.xlu0 %v2023_v38 }
 0xf15   :  { %2138 = vrot.lane.b32.xlu0 %v1969_v13, %s3441_s6 }
 0xf5e   :  { %v2127_v39 = vpop.xlane.xlu0 %2126 }
 0xf5f   :  { %v2128_v40 = vsub.f32 %v2120_v30, %v2127_v39 }
 0xf61   :  { %v2129_v0 = vmul.f32 1.442695, %v2128_v40 }
 0xf63   :  { %3261 = vpow2.f32 %v2129_v0 }
 0xf70   :  { %v3262_v41 = vpop.eup %3261 }
 0xf71   :  { %v2131_v42 = vsel %vm2016_vm11, %v3262_v41, 0.0 }
 0xf72   :  { %2132 = vadd.xlane.f32.xlu1 %v2131_v42 }
 0xf88   :  { %v2025_v43 = vpop.xlane.xlu0 %2024 }
 0xf89   :  { %3263 = vrcp.f32 %v2025_v43 }
 0xf8c   :  { %v2139_v14 = vpop.permute.xlu0 %2138 }
 0xf96   :  { %v3264_v44 = vpop.eup %3263 }
 0xf97   :  { %v2027_v46 = vmul.f32 %v3264_v44, %v3260_v37 }
 0xf99   :  { %v2028_v47 = vpack.c.bf16 %v2027_v46, %v2027_v46 }
 0xf9b   :  { %2975 = vmatmul.mubr.msk.bf16.vlgmr.msra.gmra.mxu1 %vm787_vm2, %v2028_v47 }
 0xf9c   :  { %2985 = vmatpush3.bf16.msra.mxu1 %v2139_v14  ;;  %2986 = vmatprep.mubr.msk.bf16.mxu1 %vm3451_vm0, %v3450_v1 }
 0xf9d   :  { %3010 = vmatprep.subr.bf16.mxu1 %v3450_v1 }
 0xffb   :  { %v2133_v48 = vpop.xlane.xlu1 %2132 }
 0xffc   :  { %3265 = vrcp.f32 %v2133_v48 }
0x1009   :  { %v3266_v15 = vpop.eup %3265 }
0x100a   :  { %v2135_v49 = vmul.f32 %v3266_v15, %v3262_v41 }
0x100c   :  { %v2136_v50 = vpack.c.bf16 %v2135_v49, %v2135_v49 }
0x100e   :  { %2987 = vmatmul.mubr.msk.bf16.vlgmr.msra.gmra.mxu1 %vm787_vm2, %v2136_v50 }
0x100f   :  { %3026 = vmatprep.mubr.msk.bf16.mxu1 %vm3451_vm0, %v3450_v1  ;;  %3011 = vmatpush3.bf16.msra.mxu1 %v3198_v2 }
0x1010   :  { %3012 = vmatprep.subr.bf16.mxu1 %v3450_v1 }
0x1013   :  { %3013 = vmatpush3.bf16.msra.mxu1 %v3199_v3 }
0x1014   :  { %3014 = vmatprep.subr.bf16.mxu1 %v3450_v1 }
0x1017   :  { %3015 = vmatpush3.bf16.msra.mxu1 %v3200_v4 }
0x1018   :  { %3016 = vmatprep.subr.bf16.mxu1 %v3450_v1 }
0x101b   :  { %3017 = vmatpush3.bf16.msra.mxu1 %v3201_v7 }
0x101c   :  { %3018 = vmatprep.subr.bf16.mxu1 %v3450_v1 }
0x101f   :  { %3019 = vmatpush3.bf16.msra.mxu1 %v3202_v10 }
0x1020   :  { %3020 = vmatprep.subr.bf16.mxu1 %v3450_v1 }
0x1023   :  { %3021 = vmatpush3.bf16.msra.mxu1 %v3203_v12 }
0x1024   :  { %3022 = vmatprep.subr.bf16.mxu1 %v3450_v1 }
0x1027   :  { %3023 = vmatpush3.bf16.msra.mxu1 %v3204_v36 }
0x1028   :  { %3024 = vmatprep.subr.bf16.mxu1 %v3450_v1 }
0x102b   :  { %3025 = vmatpush3.bf16.msra.mxu1 %v3205_v28 }
0x105b   :  { %v2066_v56 = vpop.f32.mrf.mxu1 }
0x105c   :  { %v2072_v13 = vpack.c.bf16 %v2066_v56, %v2066_v56 }
0x105d   :  { %v2976_v57 = vpop.f32.mrf.mxu1 }
0x105f   :  { %v2069_v59 = vpop.f32.mrf.mxu1 }
0x1061   :  { %v2977_v60 = vpop.f32.mrf.mxu1 }
0x10ce   :  { %v2178_v5 = vpop.f32.mrf.mxu1 }
0x10cf   :  { %v2184_v6 = vpack.c.bf16 %v2178_v5, %v2178_v5 }
0x10d0   :  { %v2988_v8 = vpop.f32.mrf.mxu1 }
0x10d1   :  { %2186 = vrot.lane.b32.xlu1 %v2184_v6, %s3441_s6  ;;  %s2753_s6 = sshll.u32 %s4092_s7, 6 }
0x10d2   :  { %v2181_v9 = vpop.f32.mrf.mxu1  ;;  %s3997_s0 = scalar_lea.vmem %s4055_s23, %s2753_s6 }
0x10d3   :  { %v3206_v29 = vld [vmem:[%s3997_s0 + $0x38] sm:$0xff]   ;;  %v3207_v45 = vld [vmem:[%s3997_s0 + $0x30] sm:$0xff]   ;;  %v3208_v18 = vld [vmem:[%s3997_s0 + $0x28] sm:$0xff]  }
0x10d4   :  { %v2989_v11 = vpop.f32.mrf.mxu1  ;;  %v3209_v27 = vld [vmem:[%s3997_s0 + $0x20] sm:$0xff]   ;;  %v3210_v30 = vld [vmem:[%s3997_s0 + $0x18] sm:$0xff]   ;;  %v3211_v31 = vld [vmem:[%s3997_s0 + $0x10] sm:$0xff]  }
0x10d5   :  { %v3212_v32 = vld [vmem:[%s3997_s0 + $0x8] sm:$0xff]   ;;  %v3213_v23 = vld [vmem:[%s3997_s0] sm:$0xff]  }
0x1143   :  { %v2187_v16 = vpop.permute.xlu1 %2186 }
0x1144   :  { %v2190_v17 = vsel %vm739_vm1, %v2072_v13, %v2187_v16 }
0x1145   :  { %3007 = vmatmul.mubr.bf16.vlgmr.msra.gmra.mxu0 %v2190_v17 }
0x1146   :  { %3046 = vmatprep.mubr.msk.bf16.mxu0 %vm3451_vm0, %v3450_v1  ;;  %3031 = vmatpush3.bf16.msra.mxu0 %v3206_v29 }
0x1147   :  { %3032 = vmatprep.subr.bf16.mxu0 %v3450_v1 }
0x114a   :  { %3033 = vmatpush3.bf16.msra.mxu0 %v3207_v45 }
0x114b   :  { %3034 = vmatprep.subr.bf16.mxu0 %v3450_v1 }
0x114e   :  { %3035 = vmatpush3.bf16.msra.mxu0 %v3208_v18 }
0x114f   :  { %3036 = vmatprep.subr.bf16.mxu0 %v3450_v1 }
0x1152   :  { %3037 = vmatpush3.bf16.msra.mxu0 %v3209_v27 }
0x1153   :  { %3038 = vmatprep.subr.bf16.mxu0 %v3450_v1 }
0x1156   :  { %3039 = vmatpush3.bf16.msra.mxu0 %v3210_v30 }
0x1157   :  { %3040 = vmatprep.subr.bf16.mxu0 %v3450_v1 }
0x115a   :  { %3041 = vmatpush3.bf16.msra.mxu0 %v3211_v31 }
0x115b   :  { %3042 = vmatprep.subr.bf16.mxu0 %v3450_v1 }
0x115e   :  { %3043 = vmatpush3.bf16.msra.mxu0 %v3212_v32 }
0x115f   :  { %3044 = vmatprep.subr.bf16.mxu0 %v3450_v1  ;;  %v2404_v1 = vld [vmem:[%s440_s12] sm:$0x1] }
0x1162   :  { %3045 = vmatpush3.bf16.msra.mxu0 %v3213_v23 }
0x1205   :  { %v2274_v20 = vpop.f32.mrf.mxu0 }
0x1206   :  { %v2275_v21 = vadd.f32 %v2274_v20, %v1739_v19 }
0x1207   :  { %v3008_v22 = vpop.f32.mrf.mxu0 }
0x1208   :  { %v2280_v24 = vpack.c.bf16 %v2275_v21, %v2275_v21 }
0x1209   :  { %v2277_v25 = vpop.f32.mrf.mxu0 }
0x120a   :  { %3027 = vmatmul.mubr.bf16.vlgmr.msra.gmra.mxu1 %v2280_v24 }
0x120b   :  { %v3009_v26 = vpop.f32.mrf.mxu0 }
0x12ca   :  { %v2380_v34 = vpop.f32.mrf.mxu1 }
0x12cb   :  { %v2381_v54 = vadd.f32 %v2380_v34, %v2297_v33 }
0x12cc   :  { %v3028_v35 = vpop.f32.mrf.mxu1 }
0x12cd   :  { %3267 = vtanh.f32 %v2381_v54 }
0x12ce   :  { %v2383_v37 = vpop.f32.mrf.mxu1 }
0x12d0   :  { %v3029_v38 = vpop.f32.mrf.mxu1 }
0x12da   :  { %v3268_v39 = vpop.eup %3267 }
0x12db   :  { %v2387_v40 = vpack.c.bf16 %v3268_v39, %v3268_v39 }
0x12dd   :  { %3047 = vmatmul.mubr.bf16.vlgmr.msra.gmra.mxu0 %v2387_v40 }
0x139d   :  { %v2487_v0 = vpop.f32.mrf.mxu0 }
0x139e   :  { %v2488_v41 = vadd.f32 %v2487_v0, %v2404_v1 }
0x139f   :  { %v3048_v42 = vpop.f32.mrf.mxu0 }
0x13a0   :  { %v2494_v43 = vsel %vm2493_vm12, %v2488_v41, -inf }
0x13a1   :  { %2495 = vmax.xlane.f32.xlu1 %v2494_v43  ;;  %v2490_v44 = vpop.f32.mrf.mxu0 }
0x13a3   :  { %v3049_v46 = vpop.f32.mrf.mxu0 }
0x142a   :  { %v2496_v47 = vpop.xlane.xlu1 %2495 }
0x142b   :  { %v2497_v14 = vsub.f32 %v2488_v41, %v2496_v47 }
0x142d   :  { %v2498_v48 = vmul.f32 1.442695, %v2497_v14 }
0x142f   :  { %3269 = vpow2.f32 %v2498_v48 }
0x143c   :  { %v3270_v15 = vpop.eup %3269 }
0x143d   :  { %v2500_v49 = vsel %vm2493_vm12, %v3270_v15, 0.0 }
0x143e   :  { %2501 = vadd.xlane.f32.xlu0 %v2500_v49 }
0x14c7   :  { %v2502_v50 = vpop.xlane.xlu0 %2501 }
0x14c8   :  { %3271 = vrcp.f32 %v2502_v50 }
0x14d5   :  { %v3272_v51 = vpop.eup %3271 }
0x14d6   :  { %v2504_v52 = vmul.f32 %v3272_v51, %v3270_v15 }
0x14d8   :  { %2505 = vst.msk [vmem:[%s4090_s2] sm:$0x1] %vm2493_vm12, %v2504_v52 }
0x14d9   :  { %2514 = vsyncpa [#allocation5], 1 }
0x14da   :  { %2515 = vsyncpa [#allocation7], 1 }
0x14db   :  { %2516 = vsyncpa [#allocation10], 1 }
0x14dc   :  { %2517 = vsyncpa [#allocation13], 1 }

</bundles_post_ra>
